<compile_context>
chip_gen: v6e
topology: v6e:2x2x1
jax: 0.10.0
libtpu: 0.0.40
codegen_flags: <defaults>
</compile_context>

<pallas_src>
import math

import jax
import jax.numpy as jnp
import numpy as np
from jax.experimental import pallas as pl
from jax.experimental.pallas import tpu as pltpu


def _round_up(x, m):
    return ((x + m - 1) // m) * m


# ---- module hyper-parameters (match the PyTorch module) --------------------
STATE_DIM = 16
ACTION_DIM = 4
ACTION_STD = 0.5
BATCH = 8
LANE = 128

ACTOR_DIMS = [STATE_DIM, 32, 64, 128, 256, 128, 64, 32, ACTION_DIM]
ACTOR_ACTS = ["tanh", "tanh", "relu", "tanh", "relu", "relu", "tanh", "tanh"]
CRITIC_DIMS = [STATE_DIM, 32, 64, 128, 256, 128, 64, 32, 1]
CRITIC_ACTS = ["tanh", "relu", "relu", "tanh", "relu", "relu", "tanh", None]
NUM_LAYERS = len(ACTOR_ACTS)

# ---- tight block-diagonal fused lane layout ---------------------------------
# Boundary l of the fused network holds the actor activation (ACTOR_DIMS[l]
# lanes) at lane offset A_OFF[l] and the critic activation (CRITIC_DIMS[l]
# lanes) at C_OFF[l], inside a WIDTH[l]-lane (multiple of 128) vector.  Every
# other lane is EXACTLY zero (zero weight rows/cols + zero bias + act(0)=0);
# the value extraction and mahalanobis below rely on that invariant.
WIDTH, A_OFF, C_OFF = [], [], []
for _l in range(len(ACTOR_DIMS)):
    _a, _c = ACTOR_DIMS[_l], CRITIC_DIMS[_l]
    if _l == 0:
        # shared input: both branches read the padded state at lanes [0, 16)
        WIDTH.append(LANE); A_OFF.append(0); C_OFF.append(0)
    elif _l == len(ACTOR_DIMS) - 1:
        # final boundary: action_mean at lanes [16, 20) (lines up with the
        # action lanes of the packed input), critic value at lane 0.
        WIDTH.append(LANE); A_OFF.append(STATE_DIM); C_OFF.append(0)
    elif _a + _c <= LANE:
        # tight packing: both branches share one 128-lane group
        WIDTH.append(LANE); A_OFF.append(0); C_OFF.append(_a)
    else:
        WIDTH.append(_round_up(_a, LANE) + _round_up(_c, LANE))
        A_OFF.append(0); C_OFF.append(_round_up(_a, LANE))


def _apply_act(x, act):
    if act == "tanh":
        return jnp.tanh(x)
    if act == "relu":
        return jnp.maximum(x, 0.0)
    return x


# ---------------------------------------------------------------------------
# Kernel
# ---------------------------------------------------------------------------
def actor_critic_kernel(x_ref, inv_var_ref, *refs):
    """Fused actor+critic forward + diag-MVN mahalanobis for one batch tile.

    x_ref: (TILE_B, 128) packed input (state @ lanes [0,16), action @ [16,20)).
    refs = 16 fused parameter refs (W0, b0, ..., W7, b7), then the output ref.
    Output slab (TILE_B, 128): lane 0 = -0.5*maha, lane 1 = state value.
    """
    out_ref = refs[-1]
    param_refs = refs[:-1]

    x = x_ref[...]                                  # f32, stays live for maha
    h = x
    for l in range(NUM_LAYERS):
        w = param_refs[2 * l][...]                  # (WIDTH[l], WIDTH[l+1])
        b = param_refs[2 * l + 1][...]              # (1, WIDTH[l+1]) f32
        # cast activations to the weight dtype (f32 default; bf16 if enabled)
        h = jnp.dot(h.astype(w.dtype), w,
                    preferred_element_type=jnp.float32) + b
        a_act, c_act = ACTOR_ACTS[l], CRITIC_ACTS[l]
        if a_act == c_act:
            h = _apply_act(h, a_act)
        else:
            # different activation per branch (layers 1 and 7): both halves
            # live in the same 128-lane group, so select on a lane predicate.
            a_lo = A_OFF[l + 1]
            a_hi = a_lo + ACTOR_DIMS[l + 1]
            lane = jax.lax.broadcasted_iota(jnp.int32, h.shape, 1)
            is_actor = (lane >= a_lo) & (lane < a_hi)
            h = jnp.where(is_actor, _apply_act(h, a_act), _apply_act(h, c_act))

    # final boundary: lane 0 = critic value, lanes [16,20) = action_mean,
    # every other lane exactly 0.
    lane = jax.lax.broadcasted_iota(jnp.int32, h.shape, 1)
    value_col = jnp.sum(jnp.where(lane < A_OFF[-1], h, 0.0),
                        axis=-1, keepdims=True)     # (TILE_B, 1)

    # action lives at lanes [16,20) of x, action_mean at lanes [16,20) of h,
    # inv_var is zero everywhere else -> no roll needed.
    diff = x - h
    maha = jnp.sum(diff * diff * inv_var_ref[...], axis=-1, keepdims=True)
    neg_half_maha = -0.5 * maha                     # (TILE_B, 1)

    out_lane = jax.lax.broadcasted_iota(jnp.int32, out_ref.shape, 1)
    out_ref[...] = jnp.where(out_lane == 0, neg_half_maha,
                             jnp.where(out_lane == 1, value_col, 0.0))


# ---------------------------------------------------------------------------
# Parameter packing: tight block-diagonal actor|critic fusion
# ---------------------------------------------------------------------------
def pack_fused_params(actor_params, critic_params, weight_dtype=jnp.float32):
    fused = []
    for l in range(NUM_LAYERS):
        wa, ba = actor_params[l]                    # (a_in, a_out), (a_out,)
        wc, bc = critic_params[l]                   # (c_in, c_out), (c_out,)
        a_in, a_out = wa.shape
        c_in, c_out = wc.shape
        k_in, n_out = WIDTH[l], WIDTH[l + 1]
        # NOTE: all lanes outside the two blocks stay exactly zero (weights
        # and biases) -- required by the value-extraction / maha invariants.
        w = jnp.zeros((k_in, n_out), jnp.float32)
        w = w.at[A_OFF[l]:A_OFF[l] + a_in,
                 A_OFF[l + 1]:A_OFF[l + 1] + a_out].set(wa)
        w = w.at[C_OFF[l]:C_OFF[l] + c_in,
                 C_OFF[l + 1]:C_OFF[l + 1] + c_out].set(wc)
        b = jnp.zeros((1, n_out), jnp.float32)
        b = b.at[0, A_OFF[l + 1]:A_OFF[l + 1] + a_out].set(ba)
        b = b.at[0, C_OFF[l + 1]:C_OFF[l + 1] + c_out].set(bc)
        fused.append((w.astype(weight_dtype), b))   # biases stay f32
    return fused


# ---------------------------------------------------------------------------
# Wrapper
# ---------------------------------------------------------------------------
def _pick_tile_b(batch):
    if batch <= 128:
        return _round_up(batch, 8)
    # >= 2 grid steps so both v7x TensorCores get work; cap rows/tile at 512
    # (v6e/v7x MXU row utilization + per-step overhead amortization).
    return min(512, _round_up((batch + 1) // 2, 8))


def actor_critic_evaluate(state, action, action_var, actor_params,
                          critic_params, *, use_bf16_weights=False):
    batch, s_dim = state.shape
    a_dim = action.shape[1]
    assert s_dim == STATE_DIM and a_dim == ACTION_DIM

    tile_b = _pick_tile_b(batch)
    b_pad = _round_up(batch, tile_b)
    nb = b_pad // tile_b

    # one lane-dense packed input: state @ lanes [0,16), action @ [16,20)
    x_p = jnp.zeros((b_pad, LANE), jnp.float32)
    x_p = x_p.at[:batch, :s_dim].set(state.astype(jnp.float32))
    x_p = x_p.at[:batch, s_dim:s_dim + a_dim].set(action.astype(jnp.float32))
    inv_var_p = jnp.zeros((1, LANE), jnp.float32)
    inv_var_p = inv_var_p.at[0, s_dim:s_dim + a_dim].set(1.0 / action_var)

    w_dtype = jnp.bfloat16 if use_bf16_weights else jnp.float32
    fused = pack_fused_params(actor_params, critic_params, w_dtype)

    flat_params = []
    in_specs = [
        pl.BlockSpec((tile_b, LANE), lambda i: (i, 0)),   # packed state/action
        pl.BlockSpec((1, LANE), lambda i: (0, 0)),        # inv_var (resident)
    ]
    for w, b in fused:
        flat_params += [w, b]
        in_specs += [
            pl.BlockSpec(w.shape, lambda i: (0, 0)),      # resident weights
            pl.BlockSpec(b.shape, lambda i: (0, 0)),      # resident biases
        ]

    slab = pl.pallas_call(
        actor_critic_kernel,
        out_shape=jax.ShapeDtypeStruct((b_pad, LANE), jnp.float32),
        grid=(nb,),
        in_specs=in_specs,
        out_specs=pl.BlockSpec((tile_b, LANE), lambda i: (i, 0)),
        compiler_params=pltpu.CompilerParams(
            dimension_semantics=("parallel",),
            vmem_limit_bytes=32 * 1024 * 1024),
    )(x_p, inv_var_p, *flat_params)

    # batch-independent constants, computed once outside the kernel
    k = float(a_dim)
    log_2pi = math.log(2.0 * math.pi)
    log_det = jnp.sum(jnp.log(action_var))

    logp = slab[:batch, 0] - 0.5 * (log_det + k * log_2pi)
    value = slab[:batch, 1]                          # torch.squeeze(state_value)
    entropy = jnp.broadcast_to(
        0.5 * k * (1.0 + log_2pi) + 0.5 * log_det, (batch,))
    return logp, value, entropy


# ---------------------------------------------------------------------------
# Init + pure-JAX reference
# ---------------------------------------------------------------------------
def init_linear(key, fan_in, fan_out):
    """PyTorch nn.Linear default init: U(-1/sqrt(fan_in), 1/sqrt(fan_in))."""
    kw, kb = jax.random.split(key)
    bound = 1.0 / math.sqrt(fan_in)
    w = jax.random.uniform(kw, (fan_in, fan_out), jnp.float32, -bound, bound)
    b = jax.random.uniform(kb, (fan_out,), jnp.float32, -bound, bound)
    return w, b


def init_mlp(key, dims):
    keys = jax.random.split(key, len(dims) - 1)
    return [init_linear(k, dims[i], dims[i + 1]) for i, k in enumerate(keys)]


def reference_evaluate(state, action, action_var, actor_params, critic_params):
    def mlp(x, params, acts):
        h = x
        for (w, b), act in zip(params, acts):
            h = _apply_act(h @ w + b, act)
        return h

    mean = mlp(state, actor_params, ACTOR_ACTS)
    value = mlp(state, critic_params, CRITIC_ACTS)[:, 0]
    k = float(ACTION_DIM)
    log_2pi = math.log(2.0 * math.pi)
    log_det = jnp.sum(jnp.log(action_var))
    diff = action - mean
    maha = jnp.sum(diff * diff / action_var[None, :], axis=-1)
    logp = -0.5 * (maha + log_det + k * log_2pi)
    ent = jnp.broadcast_to(
        0.5 * k * (1.0 + log_2pi) + 0.5 * log_det, (state.shape[0],))
    return logp, value, ent


if __name__ == "__main__":
    key = jax.random.PRNGKey(0)
    k_s1, k_a1, k_s2, k_a2, k_actor, k_critic = jax.random.split(key, 6)

    actor_params = init_mlp(k_actor, ACTOR_DIMS)
    critic_params = init_mlp(k_critic, CRITIC_DIMS)
    action_var = jnp.full((ACTION_DIM,), ACTION_STD * ACTION_STD, jnp.float32)

    def check(batch, ks, ka):
        state = jax.random.normal(ks, (batch, STATE_DIM), jnp.float32)
        action = jax.random.normal(ka, (batch, ACTION_DIM), jnp.float32)
        logp, value, ent = actor_critic_evaluate(
            state, action, action_var, actor_params, critic_params)
        jax.block_until_ready((logp, value, ent))
        logp_r, value_r, ent_r = reference_evaluate(
            state, action, action_var, actor_params, critic_params)
        np.testing.assert_allclose(np.asarray(logp), np.asarray(logp_r),
                                   rtol=1e-4, atol=1e-4)
        np.testing.assert_allclose(np.asarray(value), np.asarray(value_r),
                                   rtol=1e-4, atol=1e-4)
        np.testing.assert_allclose(np.asarray(ent), np.asarray(ent_r),
                                   rtol=1e-4, atol=1e-4)
        return state, action

    check(BATCH, k_s1, k_a1)            # small batch: single tile, grid=(1,)
    s2, a2 = check(200, k_s2, k_a2)     # 2-step "parallel" grid, padded rows

    # Optional bf16-weight path (halves resident weight VMEM, ~3x fewer MXU
    # passes).  Its numerics are ~1e-2, so only verify it runs and is finite;
    # the f32 default above is the bit-for-bit parity path.
    logp_b, value_b, ent_b = actor_critic_evaluate(
        s2, a2, action_var, actor_params, critic_params, use_bf16_weights=True)
    jax.block_until_ready((logp_b, value_b, ent_b))
    assert bool(jnp.all(jnp.isfinite(logp_b)))
    assert bool(jnp.all(jnp.isfinite(value_b)))

    print("KERNEL_OK")
</pallas_src>

<mosaic_0001>
module attributes {stable_mosaic.version = 11 : i64} {
  func.func @actor_critic_kernel(%arg0: i32, %arg1: memref<8x128xf32, #tpu.memory_space<vmem>>, %arg2: memref<1x128xf32, #tpu.memory_space<vmem>>, %arg3: memref<128x128xf32, #tpu.memory_space<vmem>>, %arg4: memref<1x128xf32, #tpu.memory_space<vmem>>, %arg5: memref<128x128xf32, #tpu.memory_space<vmem>>, %arg6: memref<1x128xf32, #tpu.memory_space<vmem>>, %arg7: memref<128x256xf32, #tpu.memory_space<vmem>>, %arg8: memref<1x256xf32, #tpu.memory_space<vmem>>, %arg9: memref<256x512xf32, #tpu.memory_space<vmem>>, %arg10: memref<1x512xf32, #tpu.memory_space<vmem>>, %arg11: memref<512x256xf32, #tpu.memory_space<vmem>>, %arg12: memref<1x256xf32, #tpu.memory_space<vmem>>, %arg13: memref<256x128xf32, #tpu.memory_space<vmem>>, %arg14: memref<1x128xf32, #tpu.memory_space<vmem>>, %arg15: memref<128x128xf32, #tpu.memory_space<vmem>>, %arg16: memref<1x128xf32, #tpu.memory_space<vmem>>, %arg17: memref<128x128xf32, #tpu.memory_space<vmem>>, %arg18: memref<1x128xf32, #tpu.memory_space<vmem>>, %arg19: memref<8x128xf32, #tpu.memory_space<vmem>>) attributes {dimension_semantics = [#tpu.dimension_semantics<parallel>], iteration_bounds = array<i64: 1>, scalar_prefetch = 0 : i64, scratch_operands = 0 : i64, tpu.core_type = #tpu.core_type<tc>, window_params = [{transform_indices = @transform_0, window_bounds = array<i64: 8, 128>}, {pipeline_mode = #tpu.pipeline_mode<synchronous>, transform_indices = @transform_1, window_bounds = array<i64: 1, 128>}, {pipeline_mode = #tpu.pipeline_mode<synchronous>, transform_indices = @transform_2, window_bounds = array<i64: 128, 128>}, {pipeline_mode = #tpu.pipeline_mode<synchronous>, transform_indices = @transform_3, window_bounds = array<i64: 1, 128>}, {pipeline_mode = #tpu.pipeline_mode<synchronous>, transform_indices = @transform_4, window_bounds = array<i64: 128, 128>}, {pipeline_mode = #tpu.pipeline_mode<synchronous>, transform_indices = @transform_5, window_bounds = array<i64: 1, 128>}, {pipeline_mode = #tpu.pipeline_mode<synchronous>, transform_indices = @transform_6, window_bounds = array<i64: 128, 256>}, {pipeline_mode = #tpu.pipeline_mode<synchronous>, transform_indices = @transform_7, window_bounds = array<i64: 1, 256>}, {pipeline_mode = #tpu.pipeline_mode<synchronous>, transform_indices = @transform_8, window_bounds = array<i64: 256, 512>}, {pipeline_mode = #tpu.pipeline_mode<synchronous>, transform_indices = @transform_9, window_bounds = array<i64: 1, 512>}, {pipeline_mode = #tpu.pipeline_mode<synchronous>, transform_indices = @transform_10, window_bounds = array<i64: 512, 256>}, {pipeline_mode = #tpu.pipeline_mode<synchronous>, transform_indices = @transform_11, window_bounds = array<i64: 1, 256>}, {pipeline_mode = #tpu.pipeline_mode<synchronous>, transform_indices = @transform_12, window_bounds = array<i64: 256, 128>}, {pipeline_mode = #tpu.pipeline_mode<synchronous>, transform_indices = @transform_13, window_bounds = array<i64: 1, 128>}, {pipeline_mode = #tpu.pipeline_mode<synchronous>, transform_indices = @transform_14, window_bounds = array<i64: 128, 128>}, {pipeline_mode = #tpu.pipeline_mode<synchronous>, transform_indices = @transform_15, window_bounds = array<i64: 1, 128>}, {pipeline_mode = #tpu.pipeline_mode<synchronous>, transform_indices = @transform_16, window_bounds = array<i64: 128, 128>}, {pipeline_mode = #tpu.pipeline_mode<synchronous>, transform_indices = @transform_17, window_bounds = array<i64: 1, 128>}, {transform_indices = @transform_18, window_bounds = array<i64: 8, 128>}]} {
    %c0 = arith.constant 0 : index
    %c0_0 = arith.constant 0 : index
    %0 = vector.load %arg1[%c0, %c0_0] : memref<8x128xf32, #tpu.memory_space<vmem>>, vector<8x128xf32>
    %c0_1 = arith.constant 0 : index
    %c0_2 = arith.constant 0 : index
    %1 = vector.load %arg3[%c0_1, %c0_2] : memref<128x128xf32, #tpu.memory_space<vmem>>, vector<128x128xf32>
    %c0_3 = arith.constant 0 : index
    %c0_4 = arith.constant 0 : index
    %2 = vector.load %arg4[%c0_3, %c0_4] : memref<1x128xf32, #tpu.memory_space<vmem>>, vector<1x128xf32>
    %cst = arith.constant dense<0.000000e+00> : vector<8x128xf32>
    %3 = tpu.matmul %0, %1, %cst {dimension_numbers = #tpu.dot_dimension_numbers<[1], [0], [0], [1], [0, 0, 1, 1], [], []>} : vector<8x128xf32>, vector<128x128xf32>, vector<8x128xf32> -> vector<8x128xf32>
    %4 = vector.broadcast %2 : vector<1x128xf32> to vector<8x128xf32>
    %5 = arith.addf %3, %4 : vector<8x128xf32>
    %6 = math.tanh %5 : vector<8x128xf32>
    %c0_5 = arith.constant 0 : index
    %c0_6 = arith.constant 0 : index
    %7 = vector.load %arg5[%c0_5, %c0_6] : memref<128x128xf32, #tpu.memory_space<vmem>>, vector<128x128xf32>
    %c0_7 = arith.constant 0 : index
    %c0_8 = arith.constant 0 : index
    %8 = vector.load %arg6[%c0_7, %c0_8] : memref<1x128xf32, #tpu.memory_space<vmem>>, vector<1x128xf32>
    %cst_9 = arith.constant dense<0.000000e+00> : vector<8x128xf32>
    %9 = tpu.matmul %6, %7, %cst_9 {dimension_numbers = #tpu.dot_dimension_numbers<[1], [0], [0], [1], [0, 0, 1, 1], [], []>} : vector<8x128xf32>, vector<128x128xf32>, vector<8x128xf32> -> vector<8x128xf32>
    %10 = vector.broadcast %8 : vector<1x128xf32> to vector<8x128xf32>
    %11 = arith.addf %9, %10 : vector<8x128xf32>
    %12 = tpu.iota {dimensions = array<i32: 1>} : vector<8x128xi32>
    %c0_i32 = arith.constant 0 : i32
    %13 = vector.broadcast %c0_i32 : i32 to vector<8x128xi32>
    %14 = arith.cmpi sge, %12, %13 : vector<8x128xi32>
    %c64_i32 = arith.constant 64 : i32
    %15 = vector.broadcast %c64_i32 : i32 to vector<8x128xi32>
    %16 = arith.cmpi slt, %12, %15 : vector<8x128xi32>
    %17 = arith.andi %14, %16 : vector<8x128xi1>
    %18 = math.tanh %11 : vector<8x128xf32>
    %cst_10 = arith.constant 0.000000e+00 : f32
    %19 = vector.broadcast %cst_10 : f32 to vector<8x128xf32>
    %20 = arith.maximumf %11, %19 : vector<8x128xf32>
    %21 = arith.select %17, %18, %20 : vector<8x128xi1>, vector<8x128xf32>
    %c0_11 = arith.constant 0 : index
    %c0_12 = arith.constant 0 : index
    %22 = vector.load %arg7[%c0_11, %c0_12] : memref<128x256xf32, #tpu.memory_space<vmem>>, vector<128x256xf32>
    %c0_13 = arith.constant 0 : index
    %c0_14 = arith.constant 0 : index
    %23 = vector.load %arg8[%c0_13, %c0_14] : memref<1x256xf32, #tpu.memory_space<vmem>>, vector<1x256xf32>
    %cst_15 = arith.constant dense<0.000000e+00> : vector<8x256xf32>
    %24 = tpu.matmul %21, %22, %cst_15 {dimension_numbers = #tpu.dot_dimension_numbers<[1], [0], [0], [1], [0, 0, 1, 1], [], []>} : vector<8x128xf32>, vector<128x256xf32>, vector<8x256xf32> -> vector<8x256xf32>
    %25 = vector.broadcast %23 : vector<1x256xf32> to vector<8x256xf32>
    %26 = arith.addf %24, %25 : vector<8x256xf32>
    %cst_16 = arith.constant 0.000000e+00 : f32
    %27 = vector.broadcast %cst_16 : f32 to vector<8x256xf32>
    %28 = arith.maximumf %26, %27 : vector<8x256xf32>
    %c0_17 = arith.constant 0 : index
    %c0_18 = arith.constant 0 : index
    %29 = vector.load %arg9[%c0_17, %c0_18] : memref<256x512xf32, #tpu.memory_space<vmem>>, vector<256x512xf32>
    %c0_19 = arith.constant 0 : index
    %c0_20 = arith.constant 0 : index
    %30 = vector.load %arg10[%c0_19, %c0_20] : memref<1x512xf32, #tpu.memory_space<vmem>>, vector<1x512xf32>
    %cst_21 = arith.constant dense<0.000000e+00> : vector<8x512xf32>
    %31 = tpu.matmul %28, %29, %cst_21 {dimension_numbers = #tpu.dot_dimension_numbers<[1], [0], [0], [1], [0, 0, 1, 1], [], []>} : vector<8x256xf32>, vector<256x512xf32>, vector<8x512xf32> -> vector<8x512xf32>
    %32 = vector.broadcast %30 : vector<1x512xf32> to vector<8x512xf32>
    %33 = arith.addf %31, %32 : vector<8x512xf32>
    %34 = math.tanh %33 : vector<8x512xf32>
    %c0_22 = arith.constant 0 : index
    %c0_23 = arith.constant 0 : index
    %35 = vector.load %arg11[%c0_22, %c0_23] : memref<512x256xf32, #tpu.memory_space<vmem>>, vector<512x256xf32>
    %c0_24 = arith.constant 0 : index
    %c0_25 = arith.constant 0 : index
    %36 = vector.load %arg12[%c0_24, %c0_25] : memref<1x256xf32, #tpu.memory_space<vmem>>, vector<1x256xf32>
    %cst_26 = arith.constant dense<0.000000e+00> : vector<8x256xf32>
    %37 = tpu.matmul %34, %35, %cst_26 {dimension_numbers = #tpu.dot_dimension_numbers<[1], [0], [0], [1], [0, 0, 1, 1], [], []>} : vector<8x512xf32>, vector<512x256xf32>, vector<8x256xf32> -> vector<8x256xf32>
    %38 = vector.broadcast %36 : vector<1x256xf32> to vector<8x256xf32>
    %39 = arith.addf %37, %38 : vector<8x256xf32>
    %cst_27 = arith.constant 0.000000e+00 : f32
    %40 = vector.broadcast %cst_27 : f32 to vector<8x256xf32>
    %41 = arith.maximumf %39, %40 : vector<8x256xf32>
    %c0_28 = arith.constant 0 : index
    %c0_29 = arith.constant 0 : index
    %42 = vector.load %arg13[%c0_28, %c0_29] : memref<256x128xf32, #tpu.memory_space<vmem>>, vector<256x128xf32>
    %c0_30 = arith.constant 0 : index
    %c0_31 = arith.constant 0 : index
    %43 = vector.load %arg14[%c0_30, %c0_31] : memref<1x128xf32, #tpu.memory_space<vmem>>, vector<1x128xf32>
    %cst_32 = arith.constant dense<0.000000e+00> : vector<8x128xf32>
    %44 = tpu.matmul %41, %42, %cst_32 {dimension_numbers = #tpu.dot_dimension_numbers<[1], [0], [0], [1], [0, 0, 1, 1], [], []>} : vector<8x256xf32>, vector<256x128xf32>, vector<8x128xf32> -> vector<8x128xf32>
    %45 = vector.broadcast %43 : vector<1x128xf32> to vector<8x128xf32>
    %46 = arith.addf %44, %45 : vector<8x128xf32>
    %cst_33 = arith.constant 0.000000e+00 : f32
    %47 = vector.broadcast %cst_33 : f32 to vector<8x128xf32>
    %48 = arith.maximumf %46, %47 : vector<8x128xf32>
    %c0_34 = arith.constant 0 : index
    %c0_35 = arith.constant 0 : index
    %49 = vector.load %arg15[%c0_34, %c0_35] : memref<128x128xf32, #tpu.memory_space<vmem>>, vector<128x128xf32>
    %c0_36 = arith.constant 0 : index
    %c0_37 = arith.constant 0 : index
    %50 = vector.load %arg16[%c0_36, %c0_37] : memref<1x128xf32, #tpu.memory_space<vmem>>, vector<1x128xf32>
    %cst_38 = arith.constant dense<0.000000e+00> : vector<8x128xf32>
    %51 = tpu.matmul %48, %49, %cst_38 {dimension_numbers = #tpu.dot_dimension_numbers<[1], [0], [0], [1], [0, 0, 1, 1], [], []>} : vector<8x128xf32>, vector<128x128xf32>, vector<8x128xf32> -> vector<8x128xf32>
    %52 = vector.broadcast %50 : vector<1x128xf32> to vector<8x128xf32>
    %53 = arith.addf %51, %52 : vector<8x128xf32>
    %54 = math.tanh %53 : vector<8x128xf32>
    %c0_39 = arith.constant 0 : index
    %c0_40 = arith.constant 0 : index
    %55 = vector.load %arg17[%c0_39, %c0_40] : memref<128x128xf32, #tpu.memory_space<vmem>>, vector<128x128xf32>
    %c0_41 = arith.constant 0 : index
    %c0_42 = arith.constant 0 : index
    %56 = vector.load %arg18[%c0_41, %c0_42] : memref<1x128xf32, #tpu.memory_space<vmem>>, vector<1x128xf32>
    %cst_43 = arith.constant dense<0.000000e+00> : vector<8x128xf32>
    %57 = tpu.matmul %54, %55, %cst_43 {dimension_numbers = #tpu.dot_dimension_numbers<[1], [0], [0], [1], [0, 0, 1, 1], [], []>} : vector<8x128xf32>, vector<128x128xf32>, vector<8x128xf32> -> vector<8x128xf32>
    %58 = vector.broadcast %56 : vector<1x128xf32> to vector<8x128xf32>
    %59 = arith.addf %57, %58 : vector<8x128xf32>
    %60 = tpu.iota {dimensions = array<i32: 1>} : vector<8x128xi32>
    %c16_i32 = arith.constant 16 : i32
    %61 = vector.broadcast %c16_i32 : i32 to vector<8x128xi32>
    %62 = arith.cmpi sge, %60, %61 : vector<8x128xi32>
    %c20_i32 = arith.constant 20 : i32
    %63 = vector.broadcast %c20_i32 : i32 to vector<8x128xi32>
    %64 = arith.cmpi slt, %60, %63 : vector<8x128xi32>
    %65 = arith.andi %62, %64 : vector<8x128xi1>
    %66 = math.tanh %59 : vector<8x128xf32>
    %67 = arith.select %65, %66, %59 : vector<8x128xi1>, vector<8x128xf32>
    %68 = tpu.iota {dimensions = array<i32: 1>} : vector<8x128xi32>
    %c16_i32_44 = arith.constant 16 : i32
    %69 = vector.broadcast %c16_i32_44 : i32 to vector<8x128xi32>
    %70 = arith.cmpi slt, %68, %69 : vector<8x128xi32>
    %cst_45 = arith.constant 0.000000e+00 : f32
    %71 = vector.broadcast %cst_45 : f32 to vector<8x128xf32>
    %72 = arith.select %70, %67, %71 : vector<8x128xi1>, vector<8x128xf32>
    %cst_46 = arith.constant dense<0.000000e+00> : vector<8xf32>
    %73 = vector.multi_reduction <add>, %72, %cst_46 [1] : vector<8x128xf32> to vector<8xf32>
    %74 = vector.shape_cast %73 : vector<8xf32> to vector<8x1xf32>
    %75 = arith.subf %0, %67 : vector<8x128xf32>
    %76 = arith.mulf %75, %75 : vector<8x128xf32>
    %c0_47 = arith.constant 0 : index
    %c0_48 = arith.constant 0 : index
    %77 = vector.load %arg2[%c0_47, %c0_48] : memref<1x128xf32, #tpu.memory_space<vmem>>, vector<1x128xf32>
    %78 = vector.broadcast %77 : vector<1x128xf32> to vector<8x128xf32>
    %79 = arith.mulf %76, %78 : vector<8x128xf32>
    %cst_49 = arith.constant dense<0.000000e+00> : vector<8xf32>
    %80 = vector.multi_reduction <add>, %79, %cst_49 [1] : vector<8x128xf32> to vector<8xf32>
    %81 = vector.shape_cast %80 : vector<8xf32> to vector<8x1xf32>
    %cst_50 = arith.constant -5.000000e-01 : f32
    %82 = vector.broadcast %cst_50 : f32 to vector<8x1xf32>
    %83 = arith.mulf %82, %81 : vector<8x1xf32>
    %84 = tpu.iota {dimensions = array<i32: 1>} : vector<8x128xi32>
    %c0_i32_51 = arith.constant 0 : i32
    %85 = vector.broadcast %c0_i32_51 : i32 to vector<8x128xi32>
    %86 = arith.cmpi eq, %84, %85 : vector<8x128xi32>
    %c1_i32 = arith.constant 1 : i32
    %87 = vector.broadcast %c1_i32 : i32 to vector<8x128xi32>
    %88 = arith.cmpi eq, %84, %87 : vector<8x128xi32>
    %cst_52 = arith.constant 0.000000e+00 : f32
    %89 = vector.shape_cast %74 : vector<8x1xf32> to vector<8x1xf32>
    %90 = vector.broadcast %89 : vector<8x1xf32> to vector<8x128xf32>
    %91 = vector.broadcast %cst_52 : f32 to vector<8x128xf32>
    %92 = arith.select %88, %90, %91 : vector<8x128xi1>, vector<8x128xf32>
    %93 = vector.shape_cast %83 : vector<8x1xf32> to vector<8x1xf32>
    %94 = vector.broadcast %93 : vector<8x1xf32> to vector<8x128xf32>
    %95 = arith.select %86, %94, %92 : vector<8x128xi1>, vector<8x128xf32>
    %c0_53 = arith.constant 0 : index
    %c0_54 = arith.constant 0 : index
    %96 = vector.load %arg19[%c0_53, %c0_54] : memref<8x128xf32, #tpu.memory_space<vmem>>, vector<8x128xf32>
    tpu.vector_store %arg19[%c0_53, %c0_54], %95 {strides = array<i32>} : memref<8x128xf32, #tpu.memory_space<vmem>>, vector<8x128xf32>,
    return
  }
  func.func @transform_0(%arg0: i32) -> (i32, i32) {
    %c0_i32 = arith.constant 0 : i32
    %c0_i32_0 = arith.constant 0 : i32
    return %arg0, %c0_i32 : i32, i32
  }
  func.func @transform_1(%arg0: i32) -> (i32, i32) {
    %c0_i32 = arith.constant 0 : i32
    %c0_i32_0 = arith.constant 0 : i32
    %c0_i32_1 = arith.constant 0 : i32
    return %c0_i32, %c0_i32_0 : i32, i32
  }
  func.func @transform_2(%arg0: i32) -> (i32, i32) {
    %c0_i32 = arith.constant 0 : i32
    %c0_i32_0 = arith.constant 0 : i32
    %c0_i32_1 = arith.constant 0 : i32
    return %c0_i32, %c0_i32_0 : i32, i32
  }
  func.func @transform_3(%arg0: i32) -> (i32, i32) {
    %c0_i32 = arith.constant 0 : i32
    %c0_i32_0 = arith.constant 0 : i32
    %c0_i32_1 = arith.constant 0 : i32
    return %c0_i32, %c0_i32_0 : i32, i32
  }
  func.func @transform_4(%arg0: i32) -> (i32, i32) {
    %c0_i32 = arith.constant 0 : i32
    %c0_i32_0 = arith.constant 0 : i32
    %c0_i32_1 = arith.constant 0 : i32
    return %c0_i32, %c0_i32_0 : i32, i32
  }
  func.func @transform_5(%arg0: i32) -> (i32, i32) {
    %c0_i32 = arith.constant 0 : i32
    %c0_i32_0 = arith.constant 0 : i32
    %c0_i32_1 = arith.constant 0 : i32
    return %c0_i32, %c0_i32_0 : i32, i32
  }
  func.func @transform_6(%arg0: i32) -> (i32, i32) {
    %c0_i32 = arith.constant 0 : i32
    %c0_i32_0 = arith.constant 0 : i32
    %c0_i32_1 = arith.constant 0 : i32
    return %c0_i32, %c0_i32_0 : i32, i32
  }
  func.func @transform_7(%arg0: i32) -> (i32, i32) {
    %c0_i32 = arith.constant 0 : i32
    %c0_i32_0 = arith.constant 0 : i32
    %c0_i32_1 = arith.constant 0 : i32
    return %c0_i32, %c0_i32_0 : i32, i32
  }
  func.func @transform_8(%arg0: i32) -> (i32, i32) {
    %c0_i32 = arith.constant 0 : i32
    %c0_i32_0 = arith.constant 0 : i32
    %c0_i32_1 = arith.constant 0 : i32
    return %c0_i32, %c0_i32_0 : i32, i32
  }
  func.func @transform_9(%arg0: i32) -> (i32, i32) {
    %c0_i32 = arith.constant 0 : i32
    %c0_i32_0 = arith.constant 0 : i32
    %c0_i32_1 = arith.constant 0 : i32
    return %c0_i32, %c0_i32_0 : i32, i32
  }
  func.func @transform_10(%arg0: i32) -> (i32, i32) {
    %c0_i32 = arith.constant 0 : i32
    %c0_i32_0 = arith.constant 0 : i32
    %c0_i32_1 = arith.constant 0 : i32
    return %c0_i32, %c0_i32_0 : i32, i32
  }
  func.func @transform_11(%arg0: i32) -> (i32, i32) {
    %c0_i32 = arith.constant 0 : i32
    %c0_i32_0 = arith.constant 0 : i32
    %c0_i32_1 = arith.constant 0 : i32
    return %c0_i32, %c0_i32_0 : i32, i32
  }
  func.func @transform_12(%arg0: i32) -> (i32, i32) {
    %c0_i32 = arith.constant 0 : i32
    %c0_i32_0 = arith.constant 0 : i32
    %c0_i32_1 = arith.constant 0 : i32
    return %c0_i32, %c0_i32_0 : i32, i32
  }
  func.func @transform_13(%arg0: i32) -> (i32, i32) {
    %c0_i32 = arith.constant 0 : i32
    %c0_i32_0 = arith.constant 0 : i32
    %c0_i32_1 = arith.constant 0 : i32
    return %c0_i32, %c0_i32_0 : i32, i32
  }
  func.func @transform_14(%arg0: i32) -> (i32, i32) {
    %c0_i32 = arith.constant 0 : i32
    %c0_i32_0 = arith.constant 0 : i32
    %c0_i32_1 = arith.constant 0 : i32
    return %c0_i32, %c0_i32_0 : i32, i32
  }
  func.func @transform_15(%arg0: i32) -> (i32, i32) {
    %c0_i32 = arith.constant 0 : i32
    %c0_i32_0 = arith.constant 0 : i32
    %c0_i32_1 = arith.constant 0 : i32
    return %c0_i32, %c0_i32_0 : i32, i32
  }
  func.func @transform_16(%arg0: i32) -> (i32, i32) {
    %c0_i32 = arith.constant 0 : i32
    %c0_i32_0 = arith.constant 0 : i32
    %c0_i32_1 = arith.constant 0 : i32
    return %c0_i32, %c0_i32_0 : i32, i32
  }
  func.func @transform_17(%arg0: i32) -> (i32, i32) {
    %c0_i32 = arith.constant 0 : i32
    %c0_i32_0 = arith.constant 0 : i32
    %c0_i32_1 = arith.constant 0 : i32
    return %c0_i32, %c0_i32_0 : i32, i32
  }
  func.func @transform_18(%arg0: i32) -> (i32, i32) {
    %c0_i32 = arith.constant 0 : i32
    %c0_i32_0 = arith.constant 0 : i32
    return %arg0, %c0_i32 : i32, i32
  }
}

</mosaic_0001>

<bundles_post_ra>
// kernel: tpu_custom_call.1
= control target key start
LH: loop header
LB: loop body
LE: loop exit
PB: predicated region body
PF: predicated region fallthrough
CT: control target
= control target key end

     0   :  { %s2266_s0 = inlined_call_operand.hbm [shape: f32[8,128], index: 0, kind: input, shape index: {}]   ;;  %s2267_s1 = inlined_call_operand.vmem [shape: f32[1,128], index: 1, kind: input, shape index: {}]   ;;  %s2268_s2 = inlined_call_operand.hbm [shape: f32[128,128], index: 2, kind: input, shape index: {}]   ;;  %s2269_s3 = inlined_call_operand.hbm [shape: f32[1,128], index: 3, kind: input, shape index: {}]   ;;  %s2270_s4 = inlined_call_operand.hbm [shape: f32[128,128], index: 4, kind: input, shape index: {}]   ;;  %s2271_s5 = inlined_call_operand.hbm [shape: f32[1,128], index: 5, kind: input, shape index: {}]   ;;  %s2272_s6 = inlined_call_operand.hbm [shape: f32[128,256], index: 6, kind: input, shape index: {}]   ;;  %s2273_s7 = inlined_call_operand.vmem [shape: f32[1,256], index: 7, kind: input, shape index: {}]   ;;  %s2274_s8 = inlined_call_operand.hbm [shape: f32[256,512], index: 8, kind: input, shape index: {}]   ;;  %s2275_s9 = inlined_call_operand.vmem [shape: f32[1,512], index: 9, kind: input, shape index: {}]   ;;  %s2276_s10 = inlined_call_operand.hbm [shape: f32[512,256], index: 10, kind: input, shape index: {}]   ;;  %s2277_s11 = inlined_call_operand.vmem [shape: f32[1,256], index: 11, kind: input, shape index: {}]   ;;  %s2278_s12 = inlined_call_operand.hbm [shape: f32[256,128], index: 12, kind: input, shape index: {}]   ;;  %s2279_s13 = inlined_call_operand.vmem [shape: f32[1,128], index: 13, kind: input, shape index: {}]   ;;  %s2280_s14 = inlined_call_operand.hbm [shape: f32[128,128], index: 14, kind: input, shape index: {}]   ;;  %s2281_s15 = inlined_call_operand.vmem [shape: f32[1,128], index: 15, kind: input, shape index: {}]   ;;  %s2282_s16 = inlined_call_operand.hbm [shape: f32[128,128], index: 16, kind: input, shape index: {}]   ;;  %s2283_s17 = inlined_call_operand.vmem [shape: f32[1,128], index: 17, kind: input, shape index: {}]   ;;  %s2284_s18 = inlined_call_operand.hbm [shape: f32[8,128], index: 18, kind: output, shape index: {}]  }
   0x1   :  { %2285 = sst [smem:[#allocation28_spill]] %s2266_s0 }
   0x2   :  { %2286 = sst [smem:[#allocation29_spill]] %s2267_s1 }
   0x3   :  { %2287 = sst [smem:[#allocation30_spill]] %s2268_s2 }
   0x4   :  { %23 = vsyncpa [#allocation3], 0 }
   0x5   :  { %24 = vsyncpa [#allocation6], 0 }
   0x6   :  { %25 = vsyncpa [#allocation9], 0 }
   0x7   :  { %26 = vsyncpa [#allocation12], 0 }
   0x8   :  { %27 = vsyncpa [#allocation15], 0 }
   0x9   :  { %28 = vsyncpa [#allocation18], 0 }
   0xa   :  { %29 = vsyncpa [#allocation4], 0  ;;  %s1980_s27 = smov [#allocation5]  }
   0xb   :  { %s47_s28 = sshll.u32 %s1980_s27, 4  ;;  %s48_s28 = int_to_ptr.vmem [resolvable:$true] %s47_s28 }
   0xc   :  { %s1734_s29 = scalar_lea.vmem %s48_s28, 2048  ;;  %p1739_p1 = scmp.lt.s32.totalorder %s48_s28, %s48_s28 }
   0xd   :  { %p1735_p0 = scmp.ne.s32.totalorder %s48_s28, %s1734_s29  ;;  %p1740_p2 = scmp.lt.s32.totalorder %s1734_s29, %s1734_s29 }
   0xf   :  { %p1741_p3 = por %p1740_p2, %p1739_p1 }
  0x11   :  { %p1742_p4 = pnand %p1741_p3, %p1735_p0 }
  0x13   :  { %1745 = shalt.err (!%p1742_p4)
}
  0x14   :  { %s1981_s30 = smov 128   ;;  %s1982_s0 = smov 8  }
  0x15   :  { %s2288_s20 = sld [smem:[#allocation30_spill]]  ;;  %s1983_s21 = smov [#allocation8]  }
  0x16   :  { %s69_s22 = sshll.u32 %s1983_s21, 4  ;;  %s1984_s2 = smov [#allocation11]   ;;  %s70_s22 = int_to_ptr.vmem [resolvable:$true] %s69_s22 }
  0x17   :  { %s91_s23 = sshll.u32 %s1984_s2, 4  ;;  %s1754_s24 = scalar_lea.vmem %s70_s22, 2048  ;;  %s92_s23 = int_to_ptr.vmem [resolvable:$true] %s91_s23 }
  0x18   :  { %p1755_p5 = scmp.ne.s32.totalorder %s70_s22, %s1754_s24  ;;  %p1759_p6 = scmp.lt.s32.totalorder %s70_s22, %s70_s22 }
  0x19   :  { %p1760_p7 = scmp.lt.s32.totalorder %s1754_s24, %s1754_s24 }
  0x1b   :  { %53 = dma.hbm_to_vmem [thread:$0]  %s2288_s20, 2048, %s48_s28, [#allocation6], %s1981_s30, %s1981_s30, %s1982_s0  }
  0x1c   :  { %p1761_p8 = por %p1760_p7, %p1759_p6 }
  0x1e   :  { %p1762_p9 = pnand %p1761_p8, %p1755_p5 }
  0x20   :  { %1765 = shalt.err (!%p1762_p9)
}
  0x21   :  { %75 = dma.hbm_to_vmem [thread:$0]  %s2270_s4, 2048, %s70_s22, [#allocation9], %s1981_s30, %s1981_s30, %s1982_s0  }
  0x22   :  { %s1774_s27 = scalar_lea.vmem %s92_s23, 4096  ;;  %p1779_p11 = scmp.lt.s32.totalorder %s92_s23, %s92_s23 }
  0x23   :  { %p1775_p10 = scmp.ne.s32.totalorder %s92_s23, %s1774_s27  ;;  %p1780_p12 = scmp.lt.s32.totalorder %s1774_s27, %s1774_s27 }
  0x25   :  { %p1781_p13 = por %p1780_p12, %p1779_p11 }
  0x27   :  { %p1782_p0 = pnand %p1781_p13, %p1775_p10 }
  0x29   :  { %1785 = shalt.err (!%p1782_p0)
}
  0x2a   :  { %s1985_s28 = smov 256   ;;  %s1986_s29 = smov 16  }
  0x2b   :  { %97 = dma.hbm_to_vmem [thread:$0]  %s2272_s6, 4096, %s92_s23, [#allocation12], %s1985_s28, %s1985_s28, %s1986_s29  }
  0x2c   :  { %s1987_s20 = smov [#allocation14]   ;;  %s1988_s2 = smov [#allocation17]  }
  0x2d   :  { %s119_s21 = sshll.u32 %s1987_s20, 4  ;;  %s147_s24 = sshll.u32 %s1988_s2, 4  ;;  %s120_s21 = int_to_ptr.vmem [resolvable:$true] %s119_s21  ;;  %s148_s24 = int_to_ptr.vmem [resolvable:$true] %s147_s24 }
  0x2e   :  { %s1794_s4 = scalar_lea.vmem %s120_s21, 16384  ;;  %p1799_p2 = scmp.lt.s32.totalorder %s120_s21, %s120_s21 }
  0x2f   :  { %p1795_p1 = scmp.ne.s32.totalorder %s120_s21, %s1794_s4  ;;  %p1800_p3 = scmp.lt.s32.totalorder %s1794_s4, %s1794_s4 }
  0x31   :  { %p1801_p4 = por %p1800_p3, %p1799_p2 }
  0x33   :  { %p1802_p5 = pnand %p1801_p4, %p1795_p1 }
  0x35   :  { %1805 = shalt.err (!%p1802_p5)
}
  0x36   :  { %125 = dma.hbm_to_vmem [thread:$0]  %s2276_s10, 16384, %s120_s21, [#allocation15], %s1985_s28, %s1985_s28, %s1986_s29  }
  0x37   :  { %s1814_s26 = scalar_lea.vmem %s148_s24, 2048  ;;  %p1819_p7 = scmp.lt.s32.totalorder %s148_s24, %s148_s24 }
  0x38   :  { %p1815_p6 = scmp.ne.s32.totalorder %s148_s24, %s1814_s26  ;;  %p1820_p8 = scmp.lt.s32.totalorder %s1814_s26, %s1814_s26 }
  0x3a   :  { %p1821_p9 = por %p1820_p8, %p1819_p7 }
  0x3c   :  { %p1822_p10 = pnand %p1821_p9, %p1815_p6 }
  0x3e   :  { %1825 = shalt.err (!%p1822_p10)
}
  0x3f   :  { %153 = dma.hbm_to_vmem [thread:$0]  %s2280_s14, 2048, %s148_s24, [#allocation18], %s1981_s30, %s1981_s30, %s1982_s0  }
  0x40   :  { %s1989_s27 = smov [#allocation2]   ;;  %s1990_s1 = smov [#allocation7]  }
  0x41   :  { %s36_s19 = sshll.u32 %s1989_s27, 4  ;;  %s60_s10 = sshll.u32 %s1990_s1, 4  ;;  %s37_s19 = int_to_ptr.vmem [resolvable:$true] %s36_s19  ;;  %s61_s10 = int_to_ptr.vmem [resolvable:$true] %s60_s10 }
  0x42   :  { %s1834_s28 = scalar_lea.vmem %s37_s19, 128  ;;  %p1839_p12 = scmp.lt.s32.totalorder %s37_s19, %s37_s19 }
  0x43   :  { %p1835_p11 = scmp.ne.s32.totalorder %s37_s19, %s1834_s28  ;;  %p1840_p13 = scmp.lt.s32.totalorder %s1834_s28, %s1834_s28 }
  0x45   :  { %p1841_p0 = por %p1840_p13, %p1839_p12 }
  0x47   :  { %p1842_p1 = pnand %p1841_p0, %p1835_p11 }
  0x49   :  { %1845 = shalt.err (!%p1842_p1)
}
  0x4a   :  { %s2289_s21 = sld [smem:[#allocation28_spill]]  ;;  %s1854_s2 = scalar_lea.vmem %s61_s10, 16 }
  0x4b   :  { %p1855_p2 = scmp.ne.s32.totalorder %s61_s10, %s1854_s2  ;;  %s1858_s14 = scalar_lea.vmem %s61_s10, 32 }
  0x4c   :  { %p1859_p3 = scmp.lt.s32.totalorder %s61_s10, %s61_s10  ;;  %p1860_p4 = scmp.lt.s32.totalorder %s1858_s14, %s1854_s2 }
  0x4e   :  { %p1861_p5 = por %p1860_p4, %p1859_p3 }
  0x50   :  { %39 = dma.hbm_to_vmem [thread:$0]  %s2289_s21, 128, %s37_s19, [#allocation3]  }
  0x51   :  { %p1862_p6 = pnand %p1861_p5, %p1855_p2 }
  0x53   :  { %1865 = shalt.err (!%p1862_p6)
}
  0x54   :  { %63 = dma.hbm_to_vmem [thread:$0]  %s2269_s3, 16, %s61_s10, [#allocation6]  }
  0x55   :  { %s1991_s22 = smov [#allocation10]   ;;  %s1992_s26 = smov [#allocation13]  }
  0x56   :  { %s82_s25 = sshll.u32 %s1991_s22, 4  ;;  %s105_s6 = sshll.u32 %s1992_s26, 4  ;;  %s83_s25 = int_to_ptr.vmem [resolvable:$true] %s82_s25  ;;  %s106_s6 = int_to_ptr.vmem [resolvable:$true] %s105_s6 }
  0x57   :  { %s1874_s23 = scalar_lea.vmem %s83_s25, 16  ;;  %s1878_s27 = scalar_lea.vmem %s83_s25, 32 }
  0x58   :  { %p1875_p7 = scmp.ne.s32.totalorder %s83_s25, %s1874_s23  ;;  %p1879_p8 = scmp.lt.s32.totalorder %s83_s25, %s83_s25 }
  0x59   :  { %p1880_p9 = scmp.lt.s32.totalorder %s1878_s27, %s1874_s23 }
  0x5b   :  { %p1881_p10 = por %p1880_p9, %p1879_p8 }
  0x5d   :  { %p1882_p11 = pnand %p1881_p10, %p1875_p7 }
  0x5f   :  { %1885 = shalt.err (!%p1882_p11)
}
  0x60   :  { %85 = dma.hbm_to_vmem [thread:$0]  %s2271_s5, 16, %s83_s25, [#allocation9]  }
  0x61   :  { %s1894_s28 = scalar_lea.vmem %s106_s6, 16384  ;;  %p1899_p13 = scmp.lt.s32.totalorder %s106_s6, %s106_s6 }
  0x62   :  { %p1895_p12 = scmp.ne.s32.totalorder %s106_s6, %s1894_s28  ;;  %p1900_p0 = scmp.lt.s32.totalorder %s1894_s28, %s1894_s28 }
  0x64   :  { %p1901_p1 = por %p1900_p0, %p1899_p13 }
  0x66   :  { %p1902_p2 = pnand %p1901_p1, %p1895_p12 }
  0x68   :  { %1905 = shalt.err (!%p1902_p2)
}
  0x69   :  { %s1993_s3 = smov 512   ;;  %s1994_s10 = smov 32  }
  0x6a   :  { %111 = dma.hbm_to_vmem [thread:$0]  %s2274_s8, 16384, %s106_s6, [#allocation12], %s1993_s3, %s1993_s3, %s1994_s10  }
  0x6b   :  { %s1995_s21 = smov [#allocation16]   ;;  %s1996_s14 = smov [#allocation19]  }
  0x6c   :  { %s133_s2 = sshll.u32 %s1995_s21, 4  ;;  %s161_s24 = sshll.u32 %s1996_s14, 4  ;;  %s134_s2 = int_to_ptr.vmem [resolvable:$true] %s133_s2  ;;  %s162_s24 = int_to_ptr.vmem [resolvable:$true] %s161_s24 }
  0x6d   :  { %s1914_s5 = scalar_lea.vmem %s134_s2, 4096  ;;  %p1919_p4 = scmp.lt.s32.totalorder %s134_s2, %s134_s2 }
  0x6e   :  { %p1915_p3 = scmp.ne.s32.totalorder %s134_s2, %s1914_s5  ;;  %p1920_p5 = scmp.lt.s32.totalorder %s1914_s5, %s1914_s5 }
  0x70   :  { %p1921_p6 = por %p1920_p5, %p1919_p4 }
  0x72   :  { %p1922_p7 = pnand %p1921_p6, %p1915_p3 }
  0x74   :  { %1925 = shalt.err (!%p1922_p7)
}
  0x75   :  { %139 = dma.hbm_to_vmem [thread:$0]  %s2278_s12, 4096, %s134_s2, [#allocation15], %s1981_s30, %s1981_s30, %s1982_s0  }
  0x76   :  { %s1934_s8 = scalar_lea.vmem %s162_s24, 2048  ;;  %p1939_p9 = scmp.lt.s32.totalorder %s162_s24, %s162_s24 }
  0x77   :  { %p1935_p8 = scmp.ne.s32.totalorder %s162_s24, %s1934_s8  ;;  %p1940_p10 = scmp.lt.s32.totalorder %s1934_s8, %s1934_s8 }
  0x79   :  { %p1941_p11 = por %p1940_p10, %p1939_p9 }
  0x7b   :  { %p1942_p12 = pnand %p1941_p11, %p1935_p8 }
  0x7d   :  { %1945 = shalt.err (!%p1942_p12)
}
  0x7e   :  { %167 = dma.hbm_to_vmem [thread:$0]  %s2282_s16, 2048, %s162_s24, [#allocation18], %s1981_s30, %s1981_s30, %s1982_s0  }
  0x7f   :  { %1966 = dma.done.wait [#allocation3], 128  }
  0x80   :  { %1967 = vsyncadd [#allocation3], 4294967168 }
  0x81   :  { %1968 = dma.done.wait [#allocation6], 2064  }
  0x82   :  { %1969 = vsyncadd [#allocation6], 4294965232 }
  0x83   :  { %1970 = dma.done.wait [#allocation9], 2064  }
  0x84   :  { %1971 = vsyncadd [#allocation9], 4294965232 }
  0x85   :  { %1972 = dma.done.wait [#allocation12], 20480  }
  0x86   :  { %1973 = vsyncadd [#allocation12], 4294946816 }
  0x87   :  { %1974 = dma.done.wait [#allocation15], 20480  }
  0x88   :  { %1975 = vsyncadd [#allocation15], 4294946816 }
  0x89   :  { %1976 = dma.done.wait [#allocation18], 4096  }
  0x8a   :  { %1977 = vsyncadd [#allocation18], 4294963200  ;;  %v1997_v0 = vmov 0.0   ;;  %vm1998_vm0 = vmmov 0   ;;  %v219_v1 = vld [vmem:[#allocation5 + $0x78] sm:$0xff]  ;;  %v218_v2 = vld [vmem:[#allocation5 + $0x70] sm:$0xff] }
  0x8b   :  { %1549 = vmatprep.subr.mxu0 %v1997_v0  ;;  %1581 = vmatprep.mubr.msk.f32.mxu0 %vm1998_vm0, %v1997_v0  ;;  %v217_v3 = vld [vmem:[#allocation5 + $0x68] sm:$0xff]  ;;  %v216_v4 = vld [vmem:[#allocation5 + $0x60] sm:$0xff]  ;;  %v215_v6 = vld [vmem:[#allocation5 + $0x58] sm:$0xff]  ;;  %s2290_s28 = sld [smem:[#allocation29_spill]] }
  0x8c   :  { %1584 = vmatprep.subr.mxu1 %v1997_v0  ;;  %1616 = vmatprep.mubr.msk.f32.mxu1 %vm1998_vm0, %v1997_v0  ;;  %v313_v5 = vld [vmem:[#allocation8 + $0x78] sm:$0xff]  ;;  %v312_v7 = vld [vmem:[#allocation8 + $0x70] sm:$0xff]  ;;  %v311_v8 = vld [vmem:[#allocation8 + $0x68] sm:$0xff] }
  0x8d   :  { %1550 = vmatpush3.msra.mxu0 %v219_v1  ;;  %1585 = vmatpush3.msra.mxu1 %v313_v5  ;;  %v214_v9 = vld [vmem:[#allocation5 + $0x50] sm:$0xff]  ;;  %v310_v10 = vld [vmem:[#allocation8 + $0x60] sm:$0xff]  ;;  %v309_v12 = vld [vmem:[#allocation8 + $0x58] sm:$0xff] }
  0x8e   :  { %1551 = vmatprep.subr.mxu0 %v1997_v0  ;;  %1586 = vmatprep.subr.mxu1 %v1997_v0  ;;  %v213_v11 = vld [vmem:[#allocation5 + $0x48] sm:$0xff]  ;;  %v212_v13 = vld [vmem:[#allocation5 + $0x40] sm:$0xff]  ;;  %v308_v14 = vld [vmem:[#allocation8 + $0x50] sm:$0xff] }
  0x8f   :  { %1552 = vmatpush3.msra.mxu0 %v218_v2  ;;  %1587 = vmatpush3.msra.mxu1 %v312_v7  ;;  %v211_v15 = vld [vmem:[#allocation5 + $0x38] sm:$0xff]  ;;  %v307_v16 = vld [vmem:[#allocation8 + $0x48] sm:$0xff]  ;;  %v208_v19 = vld [vmem:[#allocation5 + $0x20] sm:$0xff] }
  0x90   :  { %1553 = vmatprep.subr.mxu0 %v1997_v0  ;;  %1588 = vmatprep.subr.mxu1 %v1997_v0  ;;  %v210_v17 = vld [vmem:[#allocation5 + $0x30] sm:$0xff]  ;;  %v209_v18 = vld [vmem:[#allocation5 + $0x28] sm:$0xff]  ;;  %v207_v20 = vld [vmem:[#allocation5 + $0x18] sm:$0xff] }
  0x91   :  { %1554 = vmatpush3.msra.mxu0 %v217_v3  ;;  %1589 = vmatpush3.msra.mxu1 %v311_v8  ;;  %v206_v21 = vld [vmem:[#allocation5 + $0x10] sm:$0xff]  ;;  %v205_v22 = vld [vmem:[#allocation5 + $0x8] sm:$0xff]  ;;  %v204_v23 = vld [vmem:[#allocation5] sm:$0xff] }
  0x92   :  { %1555 = vmatprep.subr.mxu0 %v1997_v0  ;;  %1590 = vmatprep.subr.mxu1 %v1997_v0  ;;  %v203_v24 = vld [vmem:[#allocation2] sm:$0xff]  ;;  %v306_v25 = vld [vmem:[#allocation8 + $0x40] sm:$0xff]  ;;  %v303_v28 = vld [vmem:[#allocation8 + $0x28] sm:$0xff] }
  0x93   :  { %1556 = vmatpush3.msra.mxu0 %v216_v4  ;;  %1591 = vmatpush3.msra.mxu1 %v310_v10  ;;  %v305_v26 = vld [vmem:[#allocation8 + $0x38] sm:$0xff]  ;;  %v304_v27 = vld [vmem:[#allocation8 + $0x30] sm:$0xff]  ;;  %v302_v29 = vld [vmem:[#allocation8 + $0x20] sm:$0xff] }
  0x94   :  { %1557 = vmatprep.subr.mxu0 %v1997_v0  ;;  %1592 = vmatprep.subr.mxu1 %v1997_v0  ;;  %v301_v30 = vld [vmem:[#allocation8 + $0x18] sm:$0xff]  ;;  %v300_v31 = vld [vmem:[#allocation8 + $0x10] sm:$0xff]  ;;  %v299_v32 = vld [vmem:[#allocation8 + $0x8] sm:$0xff] }
  0x95   :  { %1558 = vmatpush3.msra.mxu0 %v215_v6  ;;  %1593 = vmatpush3.msra.mxu1 %v309_v12  ;;  %v298_v33 = vld [vmem:[#allocation8] sm:$0xff]  ;;  %v429_v35 = vld [vmem:[#allocation11 + $0xf0] sm:$0xff]  ;;  %v428_v36 = vld [vmem:[#allocation11 + $0xe8] sm:$0xff] }
  0x96   :  { %1559 = vmatprep.subr.mxu0 %v1997_v0  ;;  %1594 = vmatprep.subr.mxu1 %v1997_v0  ;;  %v430_v34 = vld [vmem:[#allocation11 + $0xf8] sm:$0xff]  ;;  %v427_v37 = vld [vmem:[#allocation11 + $0xe0] sm:$0xff]  ;;  %v425_v39 = vld [vmem:[#allocation11 + $0xd0] sm:$0xff] }
  0x97   :  { %1560 = vmatpush3.msra.mxu0 %v214_v9  ;;  %1595 = vmatpush3.msra.mxu1 %v308_v14  ;;  %v426_v38 = vld [vmem:[#allocation11 + $0xd8] sm:$0xff]  ;;  %v424_v40 = vld [vmem:[#allocation11 + $0xc8] sm:$0xff]  ;;  %v423_v41 = vld [vmem:[#allocation11 + $0xc0] sm:$0xff] }
  0x98   :  { %1561 = vmatprep.subr.mxu0 %v1997_v0  ;;  %1596 = vmatprep.subr.mxu1 %v1997_v0  ;;  %v422_v42 = vld [vmem:[#allocation11 + $0xb8] sm:$0xff]  ;;  %v421_v43 = vld [vmem:[#allocation11 + $0xb0] sm:$0xff]  ;;  %v420_v44 = vld [vmem:[#allocation11 + $0xa8] sm:$0xff] }
  0x99   :  { %1562 = vmatpush3.msra.mxu0 %v213_v11  ;;  %1597 = vmatpush3.msra.mxu1 %v307_v16  ;;  %v419_v45 = vld [vmem:[#allocation11 + $0xa0] sm:$0xff]  ;;  %v418_v46 = vld [vmem:[#allocation11 + $0x98] sm:$0xff]  ;;  %v417_v47 = vld [vmem:[#allocation11 + $0x90] sm:$0xff] }
  0x9a   :  { %1563 = vmatprep.subr.mxu0 %v1997_v0  ;;  %1598 = vmatprep.subr.mxu1 %v1997_v0  ;;  %v1440_v48 = vld [vmem:[#allocation7] ss:$0 sm:$0xff]  ;;  %v416_v53 = vld [vmem:[#allocation11 + $0x88] sm:$0xff]  ;;  %v415_v54 = vld [vmem:[#allocation11 + $0x80] sm:$0xff] }
  0x9b   :  { %1564 = vmatpush3.msra.mxu0 %v212_v13  ;;  %1599 = vmatpush3.msra.mxu1 %v306_v25  ;;  %v414_v55 = vld [vmem:[#allocation11 + $0x78] sm:$0xff]  ;;  %v413_v56 = vld [vmem:[#allocation11 + $0x70] sm:$0xff]  ;;  %v412_v57 = vld [vmem:[#allocation11 + $0x68] sm:$0xff] }
  0x9c   :  { %1565 = vmatprep.subr.mxu0 %v1997_v0  ;;  %1600 = vmatprep.subr.mxu1 %v1997_v0  ;;  %v411_v58 = vld [vmem:[#allocation11 + $0x60] sm:$0xff]  ;;  %v410_v59 = vld [vmem:[#allocation11 + $0x58] sm:$0xff]  ;;  %v409_v60 = vld [vmem:[#allocation11 + $0x50] sm:$0xff] }
  0x9d   :  { %1566 = vmatpush3.msra.mxu0 %v211_v15  ;;  %1601 = vmatpush3.msra.mxu1 %v305_v26  ;;  %v408_v61 = vld [vmem:[#allocation11 + $0x48] sm:$0xff]  ;;  %v407_v62 = vld [vmem:[#allocation11 + $0x40] sm:$0xff]  ;;  %v406_v63 = vld [vmem:[#allocation11 + $0x38] sm:$0xff] }
  0x9e   :  { %1567 = vmatprep.subr.mxu0 %v1997_v0  ;;  %1602 = vmatprep.subr.mxu1 %v1997_v0  ;;  %v405_v1 = vld [vmem:[#allocation11 + $0x30] sm:$0xff]  ;;  %v404_v2 = vld [vmem:[#allocation11 + $0x28] sm:$0xff]  ;;  %v403_v3 = vld [vmem:[#allocation11 + $0x20] sm:$0xff] }
  0x9f   :  { %1568 = vmatpush3.msra.mxu0 %v210_v17  ;;  %1603 = vmatpush3.msra.mxu1 %v304_v27  ;;  %v402_v4 = vld [vmem:[#allocation11 + $0x18] sm:$0xff]  ;;  %v401_v5 = vld [vmem:[#allocation11 + $0x10] sm:$0xff]  ;;  %v400_v6 = vld [vmem:[#allocation11 + $0x8] sm:$0xff] }
  0xa0   :  { %1569 = vmatprep.subr.mxu0 %v1997_v0  ;;  %1604 = vmatprep.subr.mxu1 %v1997_v0  ;;  %v399_v7 = vld [vmem:[#allocation11] sm:$0xff]  ;;  %v577_v8 = vld [vmem:[#allocation13 + $0x1e8] sm:$0xff]  ;;  %v579_v9 = vld [vmem:[#allocation13 + $0x1f8] sm:$0xff] }
  0xa1   :  { %1570 = vmatpush3.msra.mxu0 %v209_v18  ;;  %1605 = vmatpush3.msra.mxu1 %v303_v28  ;;  %v576_v10 = vld [vmem:[#allocation13 + $0x1e0] sm:$0xff]  ;;  %v573_v11 = vld [vmem:[#allocation13 + $0x1c8] sm:$0xff] }
  0xa2   :  { %1571 = vmatprep.subr.mxu0 %v1997_v0  ;;  %1606 = vmatprep.subr.mxu1 %v1997_v0  ;;  %v572_v12 = vld [vmem:[#allocation13 + $0x1c0] sm:$0xff]  ;;  %v569_v13 = vld [vmem:[#allocation13 + $0x1a8] sm:$0xff] }
  0xa3   :  { %1572 = vmatpush3.msra.mxu0 %v208_v19  ;;  %1607 = vmatpush3.msra.mxu1 %v302_v29  ;;  %v568_v14 = vld [vmem:[#allocation13 + $0x1a0] sm:$0xff]  ;;  %v565_v15 = vld [vmem:[#allocation13 + $0x188] sm:$0xff] }
  0xa4   :  { %1573 = vmatprep.subr.mxu0 %v1997_v0  ;;  %1608 = vmatprep.subr.mxu1 %v1997_v0  ;;  %v564_v16 = vld [vmem:[#allocation13 + $0x180] sm:$0xff]  ;;  %v561_v17 = vld [vmem:[#allocation13 + $0x168] sm:$0xff] }
  0xa5   :  { %1574 = vmatpush3.msra.mxu0 %v207_v20  ;;  %1609 = vmatpush3.msra.mxu1 %v301_v30  ;;  %v560_v18 = vld [vmem:[#allocation13 + $0x160] sm:$0xff]  ;;  %v557_v19 = vld [vmem:[#allocation13 + $0x148] sm:$0xff] }
  0xa6   :  { %1575 = vmatprep.subr.mxu0 %v1997_v0  ;;  %1610 = vmatprep.subr.mxu1 %v1997_v0  ;;  %v556_v20 = vld [vmem:[#allocation13 + $0x140] sm:$0xff]  ;;  %v545_v25 = vld [vmem:[#allocation13 + $0xe8] sm:$0xff] }
  0xa7   :  { %1576 = vmatpush3.msra.mxu0 %v206_v21  ;;  %1611 = vmatpush3.msra.mxu1 %v300_v31  ;;  %v553_v21 = vld [vmem:[#allocation13 + $0x128] sm:$0xff]  ;;  %v544_v26 = vld [vmem:[#allocation13 + $0xe0] sm:$0xff] }
  0xa8   :  { %1577 = vmatprep.subr.mxu0 %v1997_v0  ;;  %1612 = vmatprep.subr.mxu1 %v1997_v0  ;;  %v541_v27 = vld [vmem:[#allocation13 + $0xc8] sm:$0xff]  ;;  %v540_v28 = vld [vmem:[#allocation13 + $0xc0] sm:$0xff] }
  0xa9   :  { %1578 = vmatpush3.msra.mxu0 %v205_v22  ;;  %1613 = vmatpush3.msra.mxu1 %v299_v32  ;;  %v552_v22 = vld [vmem:[#allocation13 + $0x120] sm:$0xff]  ;;  %v537_v29 = vld [vmem:[#allocation13 + $0xa8] sm:$0xff] }
  0xaa   :  { %1579 = vmatprep.subr.mxu0 %v1997_v0  ;;  %1614 = vmatprep.subr.mxu1 %v1997_v0  ;;  %v536_v30 = vld [vmem:[#allocation13 + $0xa0] sm:$0xff]  ;;  %v533_v31 = vld [vmem:[#allocation13 + $0x88] sm:$0xff] }
  0xab   :  { %1580 = vmatpush3.msra.mxu0 %v204_v23  ;;  %1615 = vmatpush3.msra.mxu1 %v298_v33  ;;  %v549_v23 = vld [vmem:[#allocation13 + $0x108] sm:$0xff]  ;;  %v532_v32 = vld [vmem:[#allocation13 + $0x80] sm:$0xff] }
  0xac   :  { %1582 = vmatmul.mubr.f32.vlgmr.msra.gmra.mxu0 %v203_v24  ;;  %443 = vmatprep.subr.mxu0 %v430_v34  ;;  %v548_v24 = vld [vmem:[#allocation13 + $0x100] sm:$0xff]  ;;  %v529_v33 = vld [vmem:[#allocation13 + $0x68] sm:$0xff] }
  0xad   :  { %507 = vmatprep.mubr.f32.mxu0 %v1997_v0  ;;  %444 = vmatpush1.msra.mxu0 %v429_v35  ;;  %v528_v34 = vld [vmem:[#allocation13 + $0x60] sm:$0xff]  ;;  %v525_v35 = vld [vmem:[#allocation13 + $0x48] sm:$0xff] }
  0xae   :  { %445 = vmatprep.subr.mxu0 %v428_v36  ;;  %666 = vmatprep.subr.mxu1 %v577_v8  ;;  %v524_v36 = vld [vmem:[#allocation13 + $0x40] sm:$0xff] }
  0xaf   :  { %446 = vmatpush1.msra.mxu0 %v427_v37  ;;  %v521_v37 = vld [vmem:[#allocation13 + $0x28] sm:$0xff] }
  0xb0   :  { %447 = vmatprep.subr.mxu0 %v426_v38  ;;  %v520_v38 = vld [vmem:[#allocation13 + $0x20] sm:$0xff] }
  0xb1   :  { %448 = vmatpush1.msra.mxu0 %v425_v39  ;;  %v517_v39 = vld [vmem:[#allocation13 + $0x8] sm:$0xff] }
  0xb2   :  { %449 = vmatprep.subr.mxu0 %v424_v40  ;;  %v516_v40 = vld [vmem:[#allocation13] sm:$0xff] }
  0xb3   :  { %450 = vmatpush1.msra.mxu0 %v423_v41  ;;  %v641_v41 = vld [vmem:[#allocation13 + $0x3e8] sm:$0xff] }
  0xb4   :  { %451 = vmatprep.subr.mxu0 %v422_v42  ;;  %v640_v42 = vld [vmem:[#allocation13 + $0x3e0] sm:$0xff] }
  0xb5   :  { %452 = vmatpush1.msra.mxu0 %v421_v43  ;;  %v637_v43 = vld [vmem:[#allocation13 + $0x3c8] sm:$0xff] }
  0xb6   :  { %453 = vmatprep.subr.mxu0 %v420_v44  ;;  %v636_v44 = vld [vmem:[#allocation13 + $0x3c0] sm:$0xff] }
  0xb7   :  { %454 = vmatpush1.msra.mxu0 %v419_v45  ;;  %v633_v45 = vld [vmem:[#allocation13 + $0x3a8] sm:$0xff] }
  0xb8   :  { %455 = vmatprep.subr.mxu0 %v418_v46  ;;  %v632_v46 = vld [vmem:[#allocation13 + $0x3a0] sm:$0xff] }
  0xb9   :  { %456 = vmatpush1.msra.mxu0 %v417_v47  ;;  %v629_v47 = vld [vmem:[#allocation13 + $0x388] sm:$0xff] }
  0xba   :  { %457 = vmatprep.subr.mxu0 %v416_v53  ;;  %v617_v53 = vld [vmem:[#allocation13 + $0x328] sm:$0xff] }
  0xbb   :  { %458 = vmatpush1.msra.mxu0 %v415_v54  ;;  %v616_v54 = vld [vmem:[#allocation13 + $0x320] sm:$0xff] }
  0xbc   :  { %459 = vmatprep.subr.mxu0 %v414_v55  ;;  %v613_v55 = vld [vmem:[#allocation13 + $0x308] sm:$0xff] }
  0xbd   :  { %460 = vmatpush1.msra.mxu0 %v413_v56  ;;  %v612_v56 = vld [vmem:[#allocation13 + $0x300] sm:$0xff] }
  0xbe   :  { %461 = vmatprep.subr.mxu0 %v412_v57  ;;  %v609_v57 = vld [vmem:[#allocation13 + $0x2e8] sm:$0xff] }
  0xbf   :  { %462 = vmatpush1.msra.mxu0 %v411_v58  ;;  %v608_v58 = vld [vmem:[#allocation13 + $0x2e0] sm:$0xff] }
  0xc0   :  { %463 = vmatprep.subr.mxu0 %v410_v59  ;;  %v605_v59 = vld [vmem:[#allocation13 + $0x2c8] sm:$0xff] }
  0xc1   :  { %464 = vmatpush1.msra.mxu0 %v409_v60  ;;  %v604_v60 = vld [vmem:[#allocation13 + $0x2c0] sm:$0xff] }
  0xc2   :  { %465 = vmatprep.subr.mxu0 %v408_v61  ;;  %v601_v61 = vld [vmem:[#allocation13 + $0x2a8] sm:$0xff] }
  0xc3   :  { %466 = vmatpush1.msra.mxu0 %v407_v62  ;;  %v600_v62 = vld [vmem:[#allocation13 + $0x2a0] sm:$0xff] }
  0xc4   :  { %467 = vmatprep.subr.mxu0 %v406_v63  ;;  %v597_v63 = vld [vmem:[#allocation13 + $0x288] sm:$0xff] }
  0xc5   :  { %468 = vmatpush1.msra.mxu0 %v405_v1  ;;  %v596_v1 = vld [vmem:[#allocation13 + $0x280] sm:$0xff] }
  0xc6   :  { %469 = vmatprep.subr.mxu0 %v404_v2  ;;  %v1441_v2 = vld [vmem:[#allocation10] ss:$0 sm:$0xff] }
  0xc7   :  { %470 = vmatpush1.msra.mxu0 %v403_v3 }
  0xc8   :  { %471 = vmatprep.subr.mxu0 %v402_v4 }
  0xc9   :  { %472 = vmatpush1.msra.mxu0 %v401_v5 }
  0xca   :  { %473 = vmatprep.subr.mxu0 %v400_v6  ;;  %v391_v6 = vlaneseq }
  0xcb   :  { %474 = vmatpush1.msra.mxu0 %v399_v7 }
  0xcc   :  { %737 = vmatprep.subr.mxu0 %v579_v9  ;;  %v2181_v7 = vand.u32 127, %v391_v6 }
  0xce   :  { %vm394_vm1 = vcmp.lt.s32.totalorder %v2181_v7, 64  ;;  %vm1393_vm2 = vcmp.ge.s32.totalorder %v2181_v7, 16  ;;  %vm1394_vm3 = vcmp.lt.s32.totalorder %v2181_v7, 20  ;;  %vm1398_vm5 = vcmp.lt.s32.totalorder %v2181_v7, 16 }
  0xcf   :  { %vm1395_vm4 = vmand %vm1393_vm2, %vm1394_vm3  ;;  %vm1416_vm6 = vcmp.eq.s32.totalorder %v2181_v7, 1  ;;  %vm1415_vm7 = vcmp.eq.s32.totalorder %v2181_v7, 0 }
 0x16c   :  { %v293_v49 = vpop.f32.mrf.mxu0 }
 0x16d   :  { %v294_v50 = vadd.f32 %v1440_v48, %v293_v49  ;;  %v628_v48 = vld [vmem:[#allocation13 + $0x380] sm:$0xff]  ;;  %v625_v49 = vld [vmem:[#allocation13 + $0x368] sm:$0xff] }
 0x16e   :  { %v1583_v51 = vpop.f32.mrf.mxu0 }
 0x16f   :  { %1709 = vtanh.f32 %v294_v50  ;;  %v624_v50 = vld [vmem:[#allocation13 + $0x360] sm:$0xff]  ;;  %v621_v51 = vld [vmem:[#allocation13 + $0x348] sm:$0xff] }
 0x17c   :  { %v1710_v52 = vpop.eup %1709 }
 0x17d   :  { %1617 = vmatmul.mubr.f32.vlgmr.msra.gmra.mxu1 %v1710_v52  ;;  %v620_v52 = vld [vmem:[#allocation13 + $0x340] sm:$0xff] }
 0x17e   :  { %667 = vmatpush1.msra.mxu1 %v576_v10  ;;  %v578_v10 = vld [vmem:[#allocation13 + $0x1f0] sm:$0xff] }
 0x17f   :  { %668 = vmatprep.subr.mxu1 %v573_v11 }
 0x180   :  { %669 = vmatpush1.msra.mxu1 %v572_v12  ;;  %v575_v12 = vld [vmem:[#allocation13 + $0x1d8] sm:$0xff] }
 0x181   :  { %670 = vmatprep.subr.mxu1 %v569_v13  ;;  %v574_v13 = vld [vmem:[#allocation13 + $0x1d0] sm:$0xff] }
 0x182   :  { %671 = vmatpush1.msra.mxu1 %v568_v14  ;;  %v571_v14 = vld [vmem:[#allocation13 + $0x1b8] sm:$0xff] }
 0x183   :  { %672 = vmatprep.subr.mxu1 %v565_v15  ;;  %v570_v15 = vld [vmem:[#allocation13 + $0x1b0] sm:$0xff] }
 0x184   :  { %673 = vmatpush1.msra.mxu1 %v564_v16  ;;  %v567_v16 = vld [vmem:[#allocation13 + $0x198] sm:$0xff] }
 0x185   :  { %674 = vmatprep.subr.mxu1 %v561_v17  ;;  %v566_v17 = vld [vmem:[#allocation13 + $0x190] sm:$0xff] }
 0x186   :  { %675 = vmatpush1.msra.mxu1 %v560_v18  ;;  %v563_v18 = vld [vmem:[#allocation13 + $0x178] sm:$0xff] }
 0x187   :  { %676 = vmatprep.subr.mxu1 %v557_v19  ;;  %v562_v19 = vld [vmem:[#allocation13 + $0x170] sm:$0xff] }
 0x188   :  { %677 = vmatpush1.msra.mxu1 %v556_v20  ;;  %v559_v20 = vld [vmem:[#allocation13 + $0x158] sm:$0xff] }
 0x189   :  { %678 = vmatprep.subr.mxu1 %v553_v21  ;;  %v558_v21 = vld [vmem:[#allocation13 + $0x150] sm:$0xff] }
 0x18a   :  { %679 = vmatpush1.msra.mxu1 %v552_v22  ;;  %v555_v22 = vld [vmem:[#allocation13 + $0x138] sm:$0xff] }
 0x18b   :  { %680 = vmatprep.subr.mxu1 %v549_v23  ;;  %v554_v23 = vld [vmem:[#allocation13 + $0x130] sm:$0xff] }
 0x18c   :  { %681 = vmatpush1.msra.mxu1 %v548_v24  ;;  %v551_v24 = vld [vmem:[#allocation13 + $0x118] sm:$0xff] }
 0x18d   :  { %682 = vmatprep.subr.mxu1 %v545_v25  ;;  %v550_v25 = vld [vmem:[#allocation13 + $0x110] sm:$0xff] }
 0x18e   :  { %683 = vmatpush1.msra.mxu1 %v544_v26  ;;  %v547_v26 = vld [vmem:[#allocation13 + $0xf8] sm:$0xff] }
 0x18f   :  { %684 = vmatprep.subr.mxu1 %v541_v27  ;;  %v546_v27 = vld [vmem:[#allocation13 + $0xf0] sm:$0xff] }
 0x190   :  { %685 = vmatpush1.msra.mxu1 %v540_v28  ;;  %v543_v28 = vld [vmem:[#allocation13 + $0xd8] sm:$0xff] }
 0x191   :  { %686 = vmatprep.subr.mxu1 %v537_v29  ;;  %v542_v29 = vld [vmem:[#allocation13 + $0xd0] sm:$0xff] }
 0x192   :  { %687 = vmatpush1.msra.mxu1 %v536_v30  ;;  %v539_v30 = vld [vmem:[#allocation13 + $0xb8] sm:$0xff] }
 0x193   :  { %688 = vmatprep.subr.mxu1 %v533_v31  ;;  %v538_v31 = vld [vmem:[#allocation13 + $0xb0] sm:$0xff] }
 0x194   :  { %689 = vmatpush1.msra.mxu1 %v532_v32  ;;  %v535_v32 = vld [vmem:[#allocation13 + $0x98] sm:$0xff] }
 0x195   :  { %690 = vmatprep.subr.mxu1 %v529_v33  ;;  %v534_v33 = vld [vmem:[#allocation13 + $0x90] sm:$0xff] }
 0x196   :  { %691 = vmatpush1.msra.mxu1 %v528_v34  ;;  %v531_v34 = vld [vmem:[#allocation13 + $0x78] sm:$0xff] }
 0x197   :  { %692 = vmatprep.subr.mxu1 %v525_v35  ;;  %v530_v35 = vld [vmem:[#allocation13 + $0x70] sm:$0xff] }
 0x198   :  { %693 = vmatpush1.msra.mxu1 %v524_v36  ;;  %v527_v36 = vld [vmem:[#allocation13 + $0x58] sm:$0xff] }
 0x199   :  { %694 = vmatprep.subr.mxu1 %v521_v37  ;;  %v526_v37 = vld [vmem:[#allocation13 + $0x50] sm:$0xff] }
 0x19a   :  { %695 = vmatpush1.msra.mxu1 %v520_v38  ;;  %v523_v38 = vld [vmem:[#allocation13 + $0x38] sm:$0xff] }
 0x19b   :  { %696 = vmatprep.subr.mxu1 %v517_v39  ;;  %v522_v39 = vld [vmem:[#allocation13 + $0x30] sm:$0xff] }
 0x19c   :  { %697 = vmatpush1.msra.mxu1 %v516_v40  ;;  %v519_v40 = vld [vmem:[#allocation13 + $0x18] sm:$0xff] }
 0x19d   :  { %698 = vmatprep.subr.mxu1 %v641_v41  ;;  %v518_v41 = vld [vmem:[#allocation13 + $0x10] sm:$0xff] }
 0x19e   :  { %699 = vmatpush2.msra.mxu1 %v640_v42  ;;  %v643_v42 = vld [vmem:[#allocation13 + $0x3f8] sm:$0xff] }
 0x19f   :  { %700 = vmatprep.subr.mxu1 %v637_v43  ;;  %v642_v43 = vld [vmem:[#allocation13 + $0x3f0] sm:$0xff] }
 0x1a0   :  { %701 = vmatpush2.msra.mxu1 %v636_v44  ;;  %v639_v44 = vld [vmem:[#allocation13 + $0x3d8] sm:$0xff] }
 0x1a1   :  { %702 = vmatprep.subr.mxu1 %v633_v45  ;;  %v638_v45 = vld [vmem:[#allocation13 + $0x3d0] sm:$0xff] }
 0x1a2   :  { %703 = vmatpush2.msra.mxu1 %v632_v46  ;;  %v635_v46 = vld [vmem:[#allocation13 + $0x3b8] sm:$0xff] }
 0x1a3   :  { %704 = vmatprep.subr.mxu1 %v629_v47  ;;  %v634_v47 = vld [vmem:[#allocation13 + $0x3b0] sm:$0xff] }
 0x1a4   :  { %705 = vmatpush2.msra.mxu1 %v628_v48  ;;  %v631_v48 = vld [vmem:[#allocation13 + $0x398] sm:$0xff] }
 0x1a5   :  { %706 = vmatprep.subr.mxu1 %v625_v49  ;;  %v630_v49 = vld [vmem:[#allocation13 + $0x390] sm:$0xff] }
 0x1a6   :  { %707 = vmatpush2.msra.mxu1 %v624_v50  ;;  %v627_v50 = vld [vmem:[#allocation13 + $0x378] sm:$0xff] }
 0x1a7   :  { %708 = vmatprep.subr.mxu1 %v621_v51  ;;  %v626_v51 = vld [vmem:[#allocation13 + $0x370] sm:$0xff] }
 0x1a8   :  { %709 = vmatpush2.msra.mxu1 %v620_v52  ;;  %v623_v52 = vld [vmem:[#allocation13 + $0x358] sm:$0xff] }
 0x1a9   :  { %710 = vmatprep.subr.mxu1 %v617_v53  ;;  %v622_v53 = vld [vmem:[#allocation13 + $0x350] sm:$0xff] }
 0x1aa   :  { %711 = vmatpush2.msra.mxu1 %v616_v54  ;;  %v619_v54 = vld [vmem:[#allocation13 + $0x338] sm:$0xff] }
 0x1ab   :  { %712 = vmatprep.subr.mxu1 %v613_v55  ;;  %v618_v55 = vld [vmem:[#allocation13 + $0x330] sm:$0xff] }
 0x1ac   :  { %713 = vmatpush2.msra.mxu1 %v612_v56  ;;  %v615_v56 = vld [vmem:[#allocation13 + $0x318] sm:$0xff] }
 0x1ad   :  { %714 = vmatprep.subr.mxu1 %v609_v57  ;;  %v614_v57 = vld [vmem:[#allocation13 + $0x310] sm:$0xff] }
 0x1ae   :  { %715 = vmatpush2.msra.mxu1 %v608_v58  ;;  %v611_v58 = vld [vmem:[#allocation13 + $0x2f8] sm:$0xff] }
 0x1af   :  { %716 = vmatprep.subr.mxu1 %v605_v59  ;;  %v610_v59 = vld [vmem:[#allocation13 + $0x2f0] sm:$0xff] }
 0x1b0   :  { %717 = vmatpush2.msra.mxu1 %v604_v60  ;;  %v607_v60 = vld [vmem:[#allocation13 + $0x2d8] sm:$0xff] }
 0x1b1   :  { %718 = vmatprep.subr.mxu1 %v601_v61  ;;  %v606_v61 = vld [vmem:[#allocation13 + $0x2d0] sm:$0xff] }
 0x1b2   :  { %719 = vmatpush2.msra.mxu1 %v600_v62  ;;  %v603_v62 = vld [vmem:[#allocation13 + $0x2b8] sm:$0xff] }
 0x1b3   :  { %720 = vmatprep.subr.mxu1 %v597_v63  ;;  %v602_v63 = vld [vmem:[#allocation13 + $0x2b0] sm:$0xff] }
 0x1b4   :  { %721 = vmatpush2.msra.mxu1 %v596_v1  ;;  %v599_v1 = vld [vmem:[#allocation13 + $0x298] sm:$0xff] }
 0x23d   :  { %v387_v3 = vpop.f32.mrf.mxu1 }
 0x23e   :  { %v388_v4 = vadd.f32 %v1441_v2, %v387_v3  ;;  %v598_v2 = vld [vmem:[#allocation13 + $0x290] sm:$0xff]  ;;  %v593_v3 = vld [vmem:[#allocation13 + $0x268] sm:$0xff] }
 0x23f   :  { %v1618_v5 = vpop.f32.mrf.mxu1  ;;  %722 = vmatprep.subr.mxu1 %v593_v3  ;;  %v826_v3 = vld [vmem:[#allocation14 + $0x70] sm:$0xff] }
 0x240   :  { %1711 = vtanh.f32 %v388_v4  ;;  %v397_v8 = vmax.f32 %v388_v4, 0.0  ;;  %v595_v4 = vld [vmem:[#allocation13 + $0x278] sm:$0xff]  ;;  %v592_v5 = vld [vmem:[#allocation13 + $0x260] sm:$0xff] }
 0x241   :  { %723 = vmatpush2.msra.mxu1 %v592_v5  ;;  %v825_v5 = vld [vmem:[#allocation14 + $0x68] sm:$0xff] }
 0x24d   :  { %v1712_v9 = vpop.eup %1711 }
 0x24e   :  { %v398_v11 = vsel %vm394_vm1, %v1712_v9, %v397_v8  ;;  %v594_v8 = vld [vmem:[#allocation13 + $0x270] sm:$0xff]  ;;  %v589_v9 = vld [vmem:[#allocation13 + $0x248] sm:$0xff] }
 0x24f   :  { %508 = vmatmul.mubr.f32.vlgmr.msra.gmra.mxu0 %v398_v11  ;;  %724 = vmatprep.subr.mxu1 %v589_v9  ;;  %v588_v11 = vld [vmem:[#allocation13 + $0x240] sm:$0xff] }
 0x250   :  { %738 = vmatpush1.msra.mxu0 %v578_v10  ;;  %v591_v10 = vld [vmem:[#allocation13 + $0x258] sm:$0xff]  ;;  %725 = vmatpush2.msra.mxu1 %v588_v11  ;;  %v824_v9 = vld [vmem:[#allocation14 + $0x60] sm:$0xff] }
 0x251   :  { %739 = vmatprep.subr.mxu0 %v575_v12  ;;  %v590_v12 = vld [vmem:[#allocation13 + $0x250] sm:$0xff]  ;;  %v823_v11 = vld [vmem:[#allocation14 + $0x58] sm:$0xff] }
 0x252   :  { %740 = vmatpush1.msra.mxu0 %v574_v13  ;;  %v585_v13 = vld [vmem:[#allocation13 + $0x228] sm:$0xff] }
 0x253   :  { %741 = vmatprep.subr.mxu0 %v571_v14  ;;  %v587_v14 = vld [vmem:[#allocation13 + $0x238] sm:$0xff]  ;;  %726 = vmatprep.subr.mxu1 %v585_v13  ;;  %v822_v13 = vld [vmem:[#allocation14 + $0x50] sm:$0xff] }
 0x254   :  { %742 = vmatpush1.msra.mxu0 %v570_v15  ;;  %v584_v15 = vld [vmem:[#allocation13 + $0x220] sm:$0xff] }
 0x255   :  { %743 = vmatprep.subr.mxu0 %v567_v16  ;;  %v586_v16 = vld [vmem:[#allocation13 + $0x230] sm:$0xff]  ;;  %727 = vmatpush2.msra.mxu1 %v584_v15  ;;  %v821_v15 = vld [vmem:[#allocation14 + $0x48] sm:$0xff] }
 0x256   :  { %744 = vmatpush1.msra.mxu0 %v566_v17  ;;  %v581_v17 = vld [vmem:[#allocation13 + $0x208] sm:$0xff] }
 0x257   :  { %745 = vmatprep.subr.mxu0 %v563_v18  ;;  %v583_v18 = vld [vmem:[#allocation13 + $0x218] sm:$0xff]  ;;  %728 = vmatprep.subr.mxu1 %v581_v17  ;;  %v820_v17 = vld [vmem:[#allocation14 + $0x40] sm:$0xff] }
 0x258   :  { %746 = vmatpush1.msra.mxu0 %v562_v19  ;;  %v580_v19 = vld [vmem:[#allocation13 + $0x200] sm:$0xff] }
 0x259   :  { %747 = vmatprep.subr.mxu0 %v559_v20  ;;  %v582_v20 = vld [vmem:[#allocation13 + $0x210] sm:$0xff]  ;;  %729 = vmatpush2.msra.mxu1 %v580_v19  ;;  %v819_v19 = vld [vmem:[#allocation14 + $0x38] sm:$0xff] }
 0x25a   :  { %748 = vmatpush1.msra.mxu0 %v558_v21  ;;  %v843_v21 = vld [vmem:[#allocation14 + $0xf8] sm:$0xff] }
 0x25b   :  { %749 = vmatprep.subr.mxu0 %v555_v22  ;;  %v907_v22 = vld [vmem:[#allocation14 + $0x2f8] sm:$0xff]  ;;  %952 = vmatprep.subr.mxu1 %v843_v21  ;;  %v818_v21 = vld [vmem:[#allocation14 + $0x30] sm:$0xff] }
 0x25c   :  { %750 = vmatpush1.msra.mxu0 %v554_v23  ;;  %v2185_v23 = vshrl.u32 %v391_v6, 7 }
 0x25d   :  { %751 = vmatprep.subr.mxu0 %v551_v24 }
 0x25e   :  { %752 = vmatpush1.msra.mxu0 %v550_v25  ;;  %v2188_v24 = vsub.s32 0, %v2185_v23  ;;  %v431_v25 = vld [vmem:[%s2273_s7] sm:$0x3] }
 0x25f   :  { %753 = vmatprep.subr.mxu0 %v547_v26  ;;  %v2194_v26 = vsub.s32 1, %v2185_v23 }
 0x260   :  { %754 = vmatpush1.msra.mxu0 %v546_v27  ;;  %v436_v27 = vrot.slane %v431_v25, %v2188_v24 }
 0x261   :  { %755 = vmatprep.subr.mxu0 %v543_v28  ;;  %v440_v28 = vrot.slane %v431_v25, %v2194_v26  ;;  %v817_v25 = vld [vmem:[#allocation14 + $0x28] sm:$0xff] }
 0x262   :  { %756 = vmatpush1.msra.mxu0 %v542_v29 }
 0x263   :  { %757 = vmatprep.subr.mxu0 %v539_v30 }
 0x264   :  { %758 = vmatpush1.msra.mxu0 %v538_v31 }
 0x265   :  { %759 = vmatprep.subr.mxu0 %v535_v32 }
 0x266   :  { %760 = vmatpush1.msra.mxu0 %v534_v33 }
 0x267   :  { %761 = vmatprep.subr.mxu0 %v531_v34  ;;  %v842_v34 = vld [vmem:[#allocation14 + $0xf0] sm:$0xff] }
 0x268   :  { %762 = vmatpush1.msra.mxu0 %v530_v35  ;;  %v906_v35 = vld [vmem:[#allocation14 + $0x2f0] sm:$0xff] }
 0x269   :  { %763 = vmatprep.subr.mxu0 %v527_v36  ;;  %v841_v36 = vld [vmem:[#allocation14 + $0xe8] sm:$0xff] }
 0x26a   :  { %764 = vmatpush1.msra.mxu0 %v526_v37  ;;  %v905_v37 = vld [vmem:[#allocation14 + $0x2e8] sm:$0xff] }
 0x26b   :  { %765 = vmatprep.subr.mxu0 %v523_v38  ;;  %v840_v38 = vld [vmem:[#allocation14 + $0xe0] sm:$0xff] }
 0x26c   :  { %766 = vmatpush1.msra.mxu0 %v522_v39  ;;  %v904_v39 = vld [vmem:[#allocation14 + $0x2e0] sm:$0xff] }
 0x26d   :  { %767 = vmatprep.subr.mxu0 %v519_v40  ;;  %v839_v40 = vld [vmem:[#allocation14 + $0xd8] sm:$0xff] }
 0x26e   :  { %768 = vmatpush1.msra.mxu0 %v518_v41  ;;  %v903_v41 = vld [vmem:[#allocation14 + $0x2d8] sm:$0xff] }
 0x26f   :  { %769 = vmatprep.subr.mxu0 %v643_v42  ;;  %v838_v42 = vld [vmem:[#allocation14 + $0xd0] sm:$0xff] }
 0x270   :  { %770 = vmatpush2.msra.mxu0 %v642_v43  ;;  %v902_v43 = vld [vmem:[#allocation14 + $0x2d0] sm:$0xff] }
 0x271   :  { %771 = vmatprep.subr.mxu0 %v639_v44  ;;  %v837_v44 = vld [vmem:[#allocation14 + $0xc8] sm:$0xff] }
 0x272   :  { %772 = vmatpush2.msra.mxu0 %v638_v45  ;;  %v901_v45 = vld [vmem:[#allocation14 + $0x2c8] sm:$0xff] }
 0x273   :  { %773 = vmatprep.subr.mxu0 %v635_v46  ;;  %v836_v46 = vld [vmem:[#allocation14 + $0xc0] sm:$0xff] }
 0x274   :  { %774 = vmatpush2.msra.mxu0 %v634_v47  ;;  %v900_v47 = vld [vmem:[#allocation14 + $0x2c0] sm:$0xff] }
 0x275   :  { %775 = vmatprep.subr.mxu0 %v631_v48  ;;  %v835_v48 = vld [vmem:[#allocation14 + $0xb8] sm:$0xff] }
 0x276   :  { %776 = vmatpush2.msra.mxu0 %v630_v49  ;;  %v899_v49 = vld [vmem:[#allocation14 + $0x2b8] sm:$0xff] }
 0x277   :  { %777 = vmatprep.subr.mxu0 %v627_v50  ;;  %v834_v50 = vld [vmem:[#allocation14 + $0xb0] sm:$0xff] }
 0x278   :  { %778 = vmatpush2.msra.mxu0 %v626_v51  ;;  %v898_v51 = vld [vmem:[#allocation14 + $0x2b0] sm:$0xff] }
 0x279   :  { %779 = vmatprep.subr.mxu0 %v623_v52  ;;  %v833_v52 = vld [vmem:[#allocation14 + $0xa8] sm:$0xff] }
 0x27a   :  { %780 = vmatpush2.msra.mxu0 %v622_v53  ;;  %v897_v53 = vld [vmem:[#allocation14 + $0x2a8] sm:$0xff] }
 0x27b   :  { %781 = vmatprep.subr.mxu0 %v619_v54  ;;  %v832_v54 = vld [vmem:[#allocation14 + $0xa0] sm:$0xff] }
 0x27c   :  { %782 = vmatpush2.msra.mxu0 %v618_v55  ;;  %v896_v55 = vld [vmem:[#allocation14 + $0x2a0] sm:$0xff] }
 0x27d   :  { %783 = vmatprep.subr.mxu0 %v615_v56  ;;  %v831_v56 = vld [vmem:[#allocation14 + $0x98] sm:$0xff] }
 0x27e   :  { %784 = vmatpush2.msra.mxu0 %v614_v57  ;;  %v895_v57 = vld [vmem:[#allocation14 + $0x298] sm:$0xff] }
 0x27f   :  { %785 = vmatprep.subr.mxu0 %v611_v58  ;;  %v830_v58 = vld [vmem:[#allocation14 + $0x90] sm:$0xff] }
 0x280   :  { %786 = vmatpush2.msra.mxu0 %v610_v59  ;;  %v894_v59 = vld [vmem:[#allocation14 + $0x290] sm:$0xff] }
 0x281   :  { %787 = vmatprep.subr.mxu0 %v607_v60  ;;  %v829_v60 = vld [vmem:[#allocation14 + $0x88] sm:$0xff] }
 0x282   :  { %788 = vmatpush2.msra.mxu0 %v606_v61  ;;  %v893_v61 = vld [vmem:[#allocation14 + $0x288] sm:$0xff] }
 0x283   :  { %789 = vmatprep.subr.mxu0 %v603_v62  ;;  %v828_v62 = vld [vmem:[#allocation14 + $0x80] sm:$0xff] }
 0x284   :  { %790 = vmatpush2.msra.mxu0 %v602_v63  ;;  %v892_v63 = vld [vmem:[#allocation14 + $0x280] sm:$0xff] }
 0x285   :  { %791 = vmatprep.subr.mxu0 %v599_v1  ;;  %v827_v1 = vld [vmem:[#allocation14 + $0x78] sm:$0xff] }
 0x286   :  { %792 = vmatpush2.msra.mxu0 %v598_v2  ;;  %v891_v2 = vld [vmem:[#allocation14 + $0x278] sm:$0xff] }
 0x287   :  { %793 = vmatprep.subr.mxu0 %v595_v4  ;;  %v890_v4 = vld [vmem:[#allocation14 + $0x270] sm:$0xff] }
 0x288   :  { %794 = vmatpush2.msra.mxu0 %v594_v8  ;;  %v889_v8 = vld [vmem:[#allocation14 + $0x268] sm:$0xff] }
 0x289   :  { %795 = vmatprep.subr.mxu0 %v591_v10  ;;  %v888_v10 = vld [vmem:[#allocation14 + $0x260] sm:$0xff] }
 0x28a   :  { %796 = vmatpush2.msra.mxu0 %v590_v12  ;;  %v887_v12 = vld [vmem:[#allocation14 + $0x258] sm:$0xff] }
 0x28b   :  { %797 = vmatprep.subr.mxu0 %v587_v14  ;;  %v886_v14 = vld [vmem:[#allocation14 + $0x250] sm:$0xff] }
 0x28c   :  { %798 = vmatpush2.msra.mxu0 %v586_v16  ;;  %v885_v16 = vld [vmem:[#allocation14 + $0x248] sm:$0xff] }
 0x28d   :  { %799 = vmatprep.subr.mxu0 %v583_v18  ;;  %v884_v18 = vld [vmem:[#allocation14 + $0x240] sm:$0xff] }
 0x28e   :  { %800 = vmatpush2.msra.mxu0 %v582_v20  ;;  %v883_v20 = vld [vmem:[#allocation14 + $0x238] sm:$0xff] }
 0x28f   :  { %1023 = vmatprep.subr.mxu0 %v907_v22  ;;  %v882_v22 = vld [vmem:[#allocation14 + $0x230] sm:$0xff] }
 0x30f   :  { %v509_v29 = vpop.f32.mrf.mxu0 }
 0x310   :  { %v510_v30 = vadd.f32 %v509_v29, %v436_v27  ;;  %v881_v27 = vld [vmem:[#allocation14 + $0x228] sm:$0xff]  ;;  %v880_v29 = vld [vmem:[#allocation14 + $0x220] sm:$0xff] }
 0x311   :  { %v511_v31 = vpop.f32.mrf.mxu0 }
 0x312   :  { %v512_v32 = vadd.f32 %v511_v31, %v440_v28  ;;  %v514_v33 = vmax.f32 %v510_v30, 0.0  ;;  %v816_v28 = vld [vmem:[#allocation14 + $0x20] sm:$0xff]  ;;  %v815_v30 = vld [vmem:[#allocation14 + $0x18] sm:$0xff] }
 0x313   :  { %v879_v31 = vld [vmem:[#allocation14 + $0x218] sm:$0xff] }
 0x314   :  { %v515_v6 = vmax.f32 %v512_v32, 0.0  ;;  %v814_v32 = vld [vmem:[#allocation14 + $0x10] sm:$0xff] }
 0x316   :  { %730 = vmatprep.mubr.f32.mxu1 %v515_v6  ;;  %801 = vmatprep.mubr.f32.mxu0 %v515_v6  ;;  %v878_v6 = vld [vmem:[#allocation14 + $0x210] sm:$0xff] }
 0x317   :  { %731 = vmatmul.mubr.f32.vlgmr.msra.gmra.mxu1 %v514_v33  ;;  %802 = vmatmul.mubr.f32.vlgmr.msra.gmra.mxu0 %v514_v33  ;;  %v813_v33 = vld [vmem:[#allocation14 + $0x8] sm:$0xff] }
 0x318   :  { %953 = vmatpush1.msra.mxu1 %v842_v34  ;;  %1024 = vmatpush1.msra.mxu0 %v906_v35  ;;  %v877_v34 = vld [vmem:[#allocation14 + $0x208] sm:$0xff]  ;;  %v812_v35 = vld [vmem:[#allocation14] sm:$0xff] }
 0x319   :  { %954 = vmatprep.subr.mxu1 %v841_v36  ;;  %1025 = vmatprep.subr.mxu0 %v905_v37  ;;  %v876_v36 = vld [vmem:[#allocation14 + $0x200] sm:$0xff]  ;;  %v875_v37 = vld [vmem:[#allocation14 + $0x1f8] sm:$0xff] }
 0x31a   :  { %955 = vmatpush1.msra.mxu1 %v840_v38  ;;  %1026 = vmatpush1.msra.mxu0 %v904_v39  ;;  %v939_v38 = vld [vmem:[#allocation14 + $0x3f8] sm:$0xff]  ;;  %v874_v39 = vld [vmem:[#allocation14 + $0x1f0] sm:$0xff] }
 0x31b   :  { %956 = vmatprep.subr.mxu1 %v839_v40  ;;  %1027 = vmatprep.subr.mxu0 %v903_v41  ;;  %v938_v40 = vld [vmem:[#allocation14 + $0x3f0] sm:$0xff]  ;;  %v873_v41 = vld [vmem:[#allocation14 + $0x1e8] sm:$0xff] }
 0x31c   :  { %957 = vmatpush1.msra.mxu1 %v838_v42  ;;  %1028 = vmatpush1.msra.mxu0 %v902_v43  ;;  %v937_v42 = vld [vmem:[#allocation14 + $0x3e8] sm:$0xff]  ;;  %v872_v43 = vld [vmem:[#allocation14 + $0x1e0] sm:$0xff] }
 0x31d   :  { %958 = vmatprep.subr.mxu1 %v837_v44  ;;  %1029 = vmatprep.subr.mxu0 %v901_v45  ;;  %v936_v44 = vld [vmem:[#allocation14 + $0x3e0] sm:$0xff]  ;;  %v871_v45 = vld [vmem:[#allocation14 + $0x1d8] sm:$0xff] }
 0x31e   :  { %959 = vmatpush1.msra.mxu1 %v836_v46  ;;  %1030 = vmatpush1.msra.mxu0 %v900_v47  ;;  %v935_v46 = vld [vmem:[#allocation14 + $0x3d8] sm:$0xff]  ;;  %v870_v47 = vld [vmem:[#allocation14 + $0x1d0] sm:$0xff] }
 0x31f   :  { %960 = vmatprep.subr.mxu1 %v835_v48  ;;  %1031 = vmatprep.subr.mxu0 %v899_v49  ;;  %v934_v48 = vld [vmem:[#allocation14 + $0x3d0] sm:$0xff]  ;;  %v869_v49 = vld [vmem:[#allocation14 + $0x1c8] sm:$0xff] }
 0x320   :  { %961 = vmatpush1.msra.mxu1 %v834_v50  ;;  %1032 = vmatpush1.msra.mxu0 %v898_v51  ;;  %v933_v50 = vld [vmem:[#allocation14 + $0x3c8] sm:$0xff]  ;;  %v868_v51 = vld [vmem:[#allocation14 + $0x1c0] sm:$0xff] }
 0x321   :  { %962 = vmatprep.subr.mxu1 %v833_v52  ;;  %1033 = vmatprep.subr.mxu0 %v897_v53  ;;  %v932_v52 = vld [vmem:[#allocation14 + $0x3c0] sm:$0xff]  ;;  %v867_v53 = vld [vmem:[#allocation14 + $0x1b8] sm:$0xff] }
 0x322   :  { %963 = vmatpush1.msra.mxu1 %v832_v54  ;;  %1034 = vmatpush1.msra.mxu0 %v896_v55  ;;  %v931_v54 = vld [vmem:[#allocation14 + $0x3b8] sm:$0xff]  ;;  %v866_v55 = vld [vmem:[#allocation14 + $0x1b0] sm:$0xff] }
 0x323   :  { %964 = vmatprep.subr.mxu1 %v831_v56  ;;  %1035 = vmatprep.subr.mxu0 %v895_v57  ;;  %v930_v56 = vld [vmem:[#allocation14 + $0x3b0] sm:$0xff]  ;;  %v865_v57 = vld [vmem:[#allocation14 + $0x1a8] sm:$0xff] }
 0x324   :  { %965 = vmatpush1.msra.mxu1 %v830_v58  ;;  %1036 = vmatpush1.msra.mxu0 %v894_v59  ;;  %v929_v58 = vld [vmem:[#allocation14 + $0x3a8] sm:$0xff]  ;;  %v864_v59 = vld [vmem:[#allocation14 + $0x1a0] sm:$0xff] }
 0x325   :  { %966 = vmatprep.subr.mxu1 %v829_v60  ;;  %1037 = vmatprep.subr.mxu0 %v893_v61  ;;  %v928_v60 = vld [vmem:[#allocation14 + $0x3a0] sm:$0xff]  ;;  %v863_v61 = vld [vmem:[#allocation14 + $0x198] sm:$0xff] }
 0x326   :  { %967 = vmatpush1.msra.mxu1 %v828_v62  ;;  %1038 = vmatpush1.msra.mxu0 %v892_v63  ;;  %v927_v62 = vld [vmem:[#allocation14 + $0x398] sm:$0xff]  ;;  %v862_v63 = vld [vmem:[#allocation14 + $0x190] sm:$0xff] }
 0x327   :  { %968 = vmatprep.subr.mxu1 %v827_v1  ;;  %1039 = vmatprep.subr.mxu0 %v891_v2  ;;  %v926_v1 = vld [vmem:[#allocation14 + $0x390] sm:$0xff]  ;;  %v861_v2 = vld [vmem:[#allocation14 + $0x188] sm:$0xff] }
 0x328   :  { %969 = vmatpush1.msra.mxu1 %v826_v3  ;;  %1040 = vmatpush1.msra.mxu0 %v890_v4  ;;  %v925_v3 = vld [vmem:[#allocation14 + $0x388] sm:$0xff]  ;;  %v860_v4 = vld [vmem:[#allocation14 + $0x180] sm:$0xff] }
 0x329   :  { %970 = vmatprep.subr.mxu1 %v825_v5  ;;  %1041 = vmatprep.subr.mxu0 %v889_v8  ;;  %v924_v5 = vld [vmem:[#allocation14 + $0x380] sm:$0xff]  ;;  %v859_v8 = vld [vmem:[#allocation14 + $0x178] sm:$0xff] }
 0x32a   :  { %971 = vmatpush1.msra.mxu1 %v824_v9  ;;  %1042 = vmatpush1.msra.mxu0 %v888_v10  ;;  %v923_v9 = vld [vmem:[#allocation14 + $0x378] sm:$0xff]  ;;  %v858_v10 = vld [vmem:[#allocation14 + $0x170] sm:$0xff] }
 0x32b   :  { %972 = vmatprep.subr.mxu1 %v823_v11  ;;  %1043 = vmatprep.subr.mxu0 %v887_v12  ;;  %v922_v11 = vld [vmem:[#allocation14 + $0x370] sm:$0xff]  ;;  %v857_v12 = vld [vmem:[#allocation14 + $0x168] sm:$0xff] }
 0x32c   :  { %973 = vmatpush1.msra.mxu1 %v822_v13  ;;  %1044 = vmatpush1.msra.mxu0 %v886_v14  ;;  %v921_v13 = vld [vmem:[#allocation14 + $0x368] sm:$0xff]  ;;  %v856_v14 = vld [vmem:[#allocation14 + $0x160] sm:$0xff] }
 0x32d   :  { %974 = vmatprep.subr.mxu1 %v821_v15  ;;  %1045 = vmatprep.subr.mxu0 %v885_v16  ;;  %v920_v15 = vld [vmem:[#allocation14 + $0x360] sm:$0xff]  ;;  %v855_v16 = vld [vmem:[#allocation14 + $0x158] sm:$0xff] }
 0x32e   :  { %975 = vmatpush1.msra.mxu1 %v820_v17  ;;  %1046 = vmatpush1.msra.mxu0 %v884_v18  ;;  %v919_v17 = vld [vmem:[#allocation14 + $0x358] sm:$0xff]  ;;  %v854_v18 = vld [vmem:[#allocation14 + $0x150] sm:$0xff] }
 0x32f   :  { %976 = vmatprep.subr.mxu1 %v819_v19  ;;  %1047 = vmatprep.subr.mxu0 %v883_v20  ;;  %v918_v19 = vld [vmem:[#allocation14 + $0x350] sm:$0xff]  ;;  %v853_v20 = vld [vmem:[#allocation14 + $0x148] sm:$0xff] }
 0x330   :  { %977 = vmatpush1.msra.mxu1 %v818_v21  ;;  %1048 = vmatpush1.msra.mxu0 %v882_v22  ;;  %v917_v21 = vld [vmem:[#allocation14 + $0x348] sm:$0xff]  ;;  %v852_v22 = vld [vmem:[#allocation14 + $0x140] sm:$0xff] }
 0x331   :  { %978 = vmatprep.subr.mxu1 %v817_v25  ;;  %1049 = vmatprep.subr.mxu0 %v881_v27  ;;  %v916_v25 = vld [vmem:[#allocation14 + $0x340] sm:$0xff]  ;;  %v851_v27 = vld [vmem:[#allocation14 + $0x138] sm:$0xff] }
 0x332   :  { %979 = vmatpush1.msra.mxu1 %v816_v28  ;;  %1050 = vmatpush1.msra.mxu0 %v880_v29  ;;  %v915_v28 = vld [vmem:[#allocation14 + $0x338] sm:$0xff]  ;;  %v850_v29 = vld [vmem:[#allocation14 + $0x130] sm:$0xff] }
 0x333   :  { %980 = vmatprep.subr.mxu1 %v815_v30  ;;  %1051 = vmatprep.subr.mxu0 %v879_v31  ;;  %v914_v30 = vld [vmem:[#allocation14 + $0x330] sm:$0xff]  ;;  %v849_v31 = vld [vmem:[#allocation14 + $0x128] sm:$0xff] }
 0x334   :  { %981 = vmatpush1.msra.mxu1 %v814_v32  ;;  %1052 = vmatpush1.msra.mxu0 %v878_v6  ;;  %v913_v32 = vld [vmem:[#allocation14 + $0x328] sm:$0xff]  ;;  %v848_v6 = vld [vmem:[#allocation14 + $0x120] sm:$0xff] }
 0x335   :  { %982 = vmatprep.subr.mxu1 %v813_v33  ;;  %1053 = vmatprep.subr.mxu0 %v877_v34  ;;  %v912_v33 = vld [vmem:[#allocation14 + $0x320] sm:$0xff]  ;;  %v847_v34 = vld [vmem:[#allocation14 + $0x118] sm:$0xff] }
 0x336   :  { %983 = vmatpush1.msra.mxu1 %v812_v35  ;;  %1054 = vmatpush1.msra.mxu0 %v876_v36  ;;  %v911_v35 = vld [vmem:[#allocation14 + $0x318] sm:$0xff]  ;;  %v846_v36 = vld [vmem:[#allocation14 + $0x110] sm:$0xff] }
 0x337   :  { %984 = vmatprep.subr.mxu1 %v875_v37  ;;  %1055 = vmatprep.subr.mxu0 %v939_v38  ;;  %v910_v37 = vld [vmem:[#allocation14 + $0x310] sm:$0xff]  ;;  %v845_v38 = vld [vmem:[#allocation14 + $0x108] sm:$0xff] }
 0x338   :  { %985 = vmatpush2.msra.mxu1 %v874_v39  ;;  %1056 = vmatpush2.msra.mxu0 %v938_v40  ;;  %v909_v39 = vld [vmem:[#allocation14 + $0x308] sm:$0xff]  ;;  %v844_v40 = vld [vmem:[#allocation14 + $0x100] sm:$0xff] }
 0x339   :  { %986 = vmatprep.subr.mxu1 %v873_v41  ;;  %1057 = vmatprep.subr.mxu0 %v937_v42  ;;  %v908_v41 = vld [vmem:[#allocation14 + $0x300] sm:$0xff]  ;;  %v1127_v42 = vld [vmem:[#allocation16 + $0xf8] sm:$0xff] }
 0x33a   :  { %987 = vmatpush2.msra.mxu1 %v872_v43  ;;  %1058 = vmatpush2.msra.mxu0 %v936_v44  ;;  %v644_v43 = vld [vmem:[%s2275_s9] sm:$0xf]  ;;  %v656_v44 = vsub.s32 2, %v2185_v23 }
 0x33b   :  { %988 = vmatprep.subr.mxu1 %v871_v45  ;;  %1059 = vmatprep.subr.mxu0 %v935_v46  ;;  %v660_v45 = vsub.s32 3, %v2185_v23  ;;  %v649_v46 = vrot.slane %v644_v43, %v2188_v24 }
 0x33c   :  { %989 = vmatpush2.msra.mxu1 %v870_v47  ;;  %1060 = vmatpush2.msra.mxu0 %v934_v48  ;;  %v657_v47 = vrot.slane %v644_v43, %v656_v44  ;;  %v653_v48 = vrot.slane %v644_v43, %v2194_v26  ;;  %v940_v44 = vld [vmem:[%s2277_s11] sm:$0x3] }
 0x33d   :  { %990 = vmatprep.subr.mxu1 %v869_v49  ;;  %1061 = vmatprep.subr.mxu0 %v933_v50  ;;  %v661_v49 = vrot.slane %v644_v43, %v660_v45  ;;  %v1211_v43 = vld [vmem:[#allocation17 + $0x28] sm:$0xff]  ;;  %v945_v45 = vrot.slane %v940_v44, %v2188_v24  ;;  %v1209_v24 = vld [vmem:[#allocation17 + $0x18] sm:$0xff] }
 0x33e   :  { %991 = vmatpush2.msra.mxu1 %v868_v51  ;;  %1062 = vmatpush2.msra.mxu0 %v932_v52 }
 0x33f   :  { %992 = vmatprep.subr.mxu1 %v867_v53  ;;  %1063 = vmatprep.subr.mxu0 %v931_v54 }
 0x340   :  { %993 = vmatpush2.msra.mxu1 %v866_v55  ;;  %1064 = vmatpush2.msra.mxu0 %v930_v56 }
 0x341   :  { %994 = vmatprep.subr.mxu1 %v865_v57  ;;  %1065 = vmatprep.subr.mxu0 %v929_v58 }
 0x342   :  { %995 = vmatpush2.msra.mxu1 %v864_v59  ;;  %1066 = vmatpush2.msra.mxu0 %v928_v60  ;;  %v1111_v59 = vld [vmem:[#allocation16 + $0x78] sm:$0xff] }
 0x343   :  { %996 = vmatprep.subr.mxu1 %v863_v61  ;;  %1067 = vmatprep.subr.mxu0 %v927_v62  ;;  %v1126_v61 = vld [vmem:[#allocation16 + $0xf0] sm:$0xff] }
 0x344   :  { %997 = vmatpush2.msra.mxu1 %v862_v63  ;;  %1068 = vmatpush2.msra.mxu0 %v926_v1  ;;  %v1110_v63 = vld [vmem:[#allocation16 + $0x70] sm:$0xff]  ;;  %v1125_v1 = vld [vmem:[#allocation16 + $0xe8] sm:$0xff] }
 0x345   :  { %998 = vmatprep.subr.mxu1 %v861_v2  ;;  %1069 = vmatprep.subr.mxu0 %v925_v3  ;;  %v1109_v2 = vld [vmem:[#allocation16 + $0x68] sm:$0xff]  ;;  %v1124_v3 = vld [vmem:[#allocation16 + $0xe0] sm:$0xff] }
 0x346   :  { %999 = vmatpush2.msra.mxu1 %v860_v4  ;;  %1070 = vmatpush2.msra.mxu0 %v924_v5  ;;  %v1108_v4 = vld [vmem:[#allocation16 + $0x60] sm:$0xff]  ;;  %v1123_v5 = vld [vmem:[#allocation16 + $0xd8] sm:$0xff] }
 0x347   :  { %1000 = vmatprep.subr.mxu1 %v859_v8  ;;  %1071 = vmatprep.subr.mxu0 %v923_v9  ;;  %v1107_v8 = vld [vmem:[#allocation16 + $0x58] sm:$0xff]  ;;  %v1122_v9 = vld [vmem:[#allocation16 + $0xd0] sm:$0xff] }
 0x348   :  { %1001 = vmatpush2.msra.mxu1 %v858_v10  ;;  %1072 = vmatpush2.msra.mxu0 %v922_v11  ;;  %v1106_v10 = vld [vmem:[#allocation16 + $0x50] sm:$0xff]  ;;  %v1121_v11 = vld [vmem:[#allocation16 + $0xc8] sm:$0xff] }
 0x349   :  { %1002 = vmatprep.subr.mxu1 %v857_v12  ;;  %1073 = vmatprep.subr.mxu0 %v921_v13  ;;  %v1105_v12 = vld [vmem:[#allocation16 + $0x48] sm:$0xff]  ;;  %v1120_v13 = vld [vmem:[#allocation16 + $0xc0] sm:$0xff] }
 0x34a   :  { %1003 = vmatpush2.msra.mxu1 %v856_v14  ;;  %1074 = vmatpush2.msra.mxu0 %v920_v15  ;;  %v1104_v14 = vld [vmem:[#allocation16 + $0x40] sm:$0xff]  ;;  %v1119_v15 = vld [vmem:[#allocation16 + $0xb8] sm:$0xff] }
 0x34b   :  { %1004 = vmatprep.subr.mxu1 %v855_v16  ;;  %1075 = vmatprep.subr.mxu0 %v919_v17  ;;  %v1103_v16 = vld [vmem:[#allocation16 + $0x38] sm:$0xff]  ;;  %v1118_v17 = vld [vmem:[#allocation16 + $0xb0] sm:$0xff] }
 0x34c   :  { %1005 = vmatpush2.msra.mxu1 %v854_v18  ;;  %1076 = vmatpush2.msra.mxu0 %v918_v19  ;;  %v1102_v18 = vld [vmem:[#allocation16 + $0x30] sm:$0xff]  ;;  %v1117_v19 = vld [vmem:[#allocation16 + $0xa8] sm:$0xff] }
 0x34d   :  { %1006 = vmatprep.subr.mxu1 %v853_v20  ;;  %1077 = vmatprep.subr.mxu0 %v917_v21  ;;  %v1101_v20 = vld [vmem:[#allocation16 + $0x28] sm:$0xff]  ;;  %v1116_v21 = vld [vmem:[#allocation16 + $0xa0] sm:$0xff] }
 0x34e   :  { %1007 = vmatpush2.msra.mxu1 %v852_v22  ;;  %1078 = vmatpush2.msra.mxu0 %v916_v25  ;;  %v1100_v22 = vld [vmem:[#allocation16 + $0x20] sm:$0xff]  ;;  %v1115_v25 = vld [vmem:[#allocation16 + $0x98] sm:$0xff] }
 0x34f   :  { %1008 = vmatprep.subr.mxu1 %v851_v27  ;;  %1079 = vmatprep.subr.mxu0 %v915_v28  ;;  %v1099_v27 = vld [vmem:[#allocation16 + $0x18] sm:$0xff]  ;;  %v1114_v28 = vld [vmem:[#allocation16 + $0x90] sm:$0xff] }
 0x350   :  { %1009 = vmatpush2.msra.mxu1 %v850_v29  ;;  %1080 = vmatpush2.msra.mxu0 %v914_v30  ;;  %v1098_v29 = vld [vmem:[#allocation16 + $0x10] sm:$0xff]  ;;  %v1113_v30 = vld [vmem:[#allocation16 + $0x88] sm:$0xff] }
 0x351   :  { %1010 = vmatprep.subr.mxu1 %v849_v31  ;;  %1081 = vmatprep.subr.mxu0 %v913_v32  ;;  %v1097_v31 = vld [vmem:[#allocation16 + $0x8] sm:$0xff]  ;;  %v1112_v32 = vld [vmem:[#allocation16 + $0x80] sm:$0xff] }
 0x352   :  { %1011 = vmatpush2.msra.mxu1 %v848_v6  ;;  %1082 = vmatpush2.msra.mxu0 %v912_v33  ;;  %v1096_v6 = vld [vmem:[#allocation16] sm:$0xff]  ;;  %v1221_v33 = vld [vmem:[#allocation17 + $0x78] sm:$0xff] }
 0x353   :  { %1012 = vmatprep.subr.mxu1 %v847_v34  ;;  %1083 = vmatprep.subr.mxu0 %v911_v35  ;;  %v1220_v34 = vld [vmem:[#allocation17 + $0x70] sm:$0xff]  ;;  %v1219_v35 = vld [vmem:[#allocation17 + $0x68] sm:$0xff] }
 0x354   :  { %1013 = vmatpush2.msra.mxu1 %v846_v36  ;;  %1084 = vmatpush2.msra.mxu0 %v910_v37  ;;  %v1218_v36 = vld [vmem:[#allocation17 + $0x60] sm:$0xff]  ;;  %v1217_v37 = vld [vmem:[#allocation17 + $0x58] sm:$0xff] }
 0x355   :  { %1014 = vmatprep.subr.mxu1 %v845_v38  ;;  %1085 = vmatprep.subr.mxu0 %v909_v39  ;;  %v1216_v38 = vld [vmem:[#allocation17 + $0x50] sm:$0xff]  ;;  %v1215_v39 = vld [vmem:[#allocation17 + $0x48] sm:$0xff] }
 0x356   :  { %1015 = vmatpush2.msra.mxu1 %v844_v40  ;;  %1086 = vmatpush2.msra.mxu0 %v908_v41  ;;  %v1214_v40 = vld [vmem:[#allocation17 + $0x40] sm:$0xff]  ;;  %v1213_v41 = vld [vmem:[#allocation17 + $0x38] sm:$0xff] }
 0x357   :  { %1619 = vmatprep.subr.mxu0 %v1997_v0  ;;  %1480 = vmatprep.subr.mxu1 %v1127_v42  ;;  %v1212_v42 = vld [vmem:[#allocation17 + $0x30] sm:$0xff] }
 0x3d7   :  { %v732_v50 = vpop.f32.mrf.mxu1  ;;  %v803_v51 = vpop.f32.mrf.mxu0 }
 0x3d8   :  { %v733_v52 = vadd.f32 %v732_v50, %v649_v46  ;;  %v804_v55 = vadd.f32 %v803_v51, %v657_v47  ;;  %v949_v46 = vrot.slane %v940_v44, %v2194_v26  ;;  %v1208_v26 = vld [vmem:[#allocation17 + $0x10] sm:$0xff] }
 0x3d9   :  { %v734_v53 = vpop.f32.mrf.mxu1  ;;  %v805_v54 = vpop.f32.mrf.mxu0 }
 0x3da   :  { %v735_v56 = vadd.f32 %v734_v53, %v653_v48  ;;  %v806_v57 = vadd.f32 %v805_v54, %v661_v49  ;;  %1713 = vtanh.f32 %v733_v52 }
 0x3dc   :  { %1715 = vtanh.f32 %v735_v56 }
 0x3dd   :  { %1717 = vtanh.f32 %v806_v57  ;;  %v1210_v57 = vld [vmem:[#allocation17 + $0x20] sm:$0xff] }
 0x3de   :  { %1719 = vtanh.f32 %v804_v55 }
 0x3e7   :  { %v1714_v58 = vpop.eup %1713 }
 0x3e9   :  { %v1716_v23 = vpop.eup %1715 }
 0x3ea   :  { %v1718_v60 = vpop.eup %1717  ;;  %1016 = vmatprep.mubr.f32.mxu1 %v1716_v23  ;;  %v1206_v23 = vld [vmem:[#allocation17] sm:$0xff] }
 0x3eb   :  { %v1720_v62 = vpop.eup %1719  ;;  %1087 = vmatprep.mubr.f32.mxu0 %v1718_v60  ;;  %1017 = vmatmul.mubr.f32.vlgmr.msra.gmra.mxu1 %v1714_v58  ;;  %v1207_v58 = vld [vmem:[#allocation17 + $0x8] sm:$0xff]  ;;  %v1314_v60 = vld [vmem:[#allocation19 + $0x70] sm:$0xff] }
 0x3ec   :  { %1088 = vmatmul.mubr.f32.vlgmr.msra.gmra.mxu0 %v1720_v62  ;;  %1481 = vmatpush3.msra.mxu1 %v1111_v59  ;;  %v1315_v59 = vld [vmem:[#allocation19 + $0x78] sm:$0xff]  ;;  %v1312_v62 = vld [vmem:[#allocation19 + $0x60] sm:$0xff] }
 0x3ed   :  { %1482 = vmatprep.subr.mxu1 %v1126_v61  ;;  %1651 = vmatprep.mubr.msk.f32.mxu0 %vm1998_vm0, %v1997_v0  ;;  %v1313_v61 = vld [vmem:[#allocation19 + $0x68] sm:$0xff] }
 0x3ee   :  { %1483 = vmatpush3.msra.mxu1 %v1110_v63  ;;  %1620 = vmatpush3.msra.mxu0 %v1221_v33  ;;  %v1311_v63 = vld [vmem:[#allocation19 + $0x58] sm:$0xff] }
 0x3ef   :  { %1484 = vmatprep.subr.mxu1 %v1125_v1  ;;  %1621 = vmatprep.subr.mxu0 %v1997_v0  ;;  %v1310_v1 = vld [vmem:[#allocation19 + $0x50] sm:$0xff] }
 0x3f0   :  { %1485 = vmatpush3.msra.mxu1 %v1109_v2  ;;  %1622 = vmatpush3.msra.mxu0 %v1220_v34  ;;  %v1309_v2 = vld [vmem:[#allocation19 + $0x48] sm:$0xff]  ;;  %v1445_v34 = vld [vmem:[%s2290_s28] ss:$0 sm:$0xff] }
 0x3f1   :  { %1486 = vmatprep.subr.mxu1 %v1124_v3  ;;  %1623 = vmatprep.subr.mxu0 %v1997_v0 }
 0x3f2   :  { %1487 = vmatpush3.msra.mxu1 %v1108_v4  ;;  %1624 = vmatpush3.msra.mxu0 %v1219_v35  ;;  %v1442_v4 = vld [vmem:[%s2279_s13] ss:$0 sm:$0xff] }
 0x3f3   :  { %1488 = vmatprep.subr.mxu1 %v1123_v5  ;;  %1625 = vmatprep.subr.mxu0 %v1997_v0 }
 0x3f4   :  { %1489 = vmatpush3.msra.mxu1 %v1107_v8  ;;  %1626 = vmatpush3.msra.mxu0 %v1218_v36 }
 0x3f5   :  { %1490 = vmatprep.subr.mxu1 %v1122_v9  ;;  %1627 = vmatprep.subr.mxu0 %v1997_v0 }
 0x3f6   :  { %1491 = vmatpush3.msra.mxu1 %v1106_v10  ;;  %1628 = vmatpush3.msra.mxu0 %v1217_v37 }
 0x3f7   :  { %1492 = vmatprep.subr.mxu1 %v1121_v11  ;;  %1629 = vmatprep.subr.mxu0 %v1997_v0  ;;  %v1308_v11 = vld [vmem:[#allocation19 + $0x40] sm:$0xff] }
 0x3f8   :  { %1493 = vmatpush3.msra.mxu1 %v1105_v12  ;;  %1630 = vmatpush3.msra.mxu0 %v1216_v38  ;;  %v1307_v12 = vld [vmem:[#allocation19 + $0x38] sm:$0xff] }
 0x3f9   :  { %1494 = vmatprep.subr.mxu1 %v1120_v13  ;;  %1631 = vmatprep.subr.mxu0 %v1997_v0  ;;  %v1306_v13 = vld [vmem:[#allocation19 + $0x30] sm:$0xff] }
 0x3fa   :  { %1495 = vmatpush3.msra.mxu1 %v1104_v14  ;;  %1632 = vmatpush3.msra.mxu0 %v1215_v39  ;;  %v1305_v14 = vld [vmem:[#allocation19 + $0x28] sm:$0xff] }
 0x3fb   :  { %1496 = vmatprep.subr.mxu1 %v1119_v15  ;;  %1633 = vmatprep.subr.mxu0 %v1997_v0  ;;  %v1304_v15 = vld [vmem:[#allocation19 + $0x20] sm:$0xff] }
 0x3fc   :  { %1497 = vmatpush3.msra.mxu1 %v1103_v16  ;;  %1634 = vmatpush3.msra.mxu0 %v1214_v40  ;;  %v1303_v16 = vld [vmem:[#allocation19 + $0x18] sm:$0xff] }
 0x3fd   :  { %1498 = vmatprep.subr.mxu1 %v1118_v17  ;;  %1635 = vmatprep.subr.mxu0 %v1997_v0  ;;  %v1302_v17 = vld [vmem:[#allocation19 + $0x10] sm:$0xff] }
 0x3fe   :  { %1499 = vmatpush3.msra.mxu1 %v1102_v18  ;;  %1636 = vmatpush3.msra.mxu0 %v1213_v41  ;;  %v1301_v18 = vld [vmem:[#allocation19 + $0x8] sm:$0xff] }
 0x3ff   :  { %1500 = vmatprep.subr.mxu1 %v1117_v19  ;;  %1637 = vmatprep.subr.mxu0 %v1997_v0  ;;  %v1300_v19 = vld [vmem:[#allocation19] sm:$0xff] }
 0x400   :  { %1501 = vmatpush3.msra.mxu1 %v1101_v20  ;;  %1638 = vmatpush3.msra.mxu0 %v1212_v42  ;;  %v1443_v20 = vld [vmem:[%s2281_s15] ss:$0 sm:$0xff] }
 0x401   :  { %1502 = vmatprep.subr.mxu1 %v1116_v21  ;;  %1639 = vmatprep.subr.mxu0 %v1997_v0 }
 0x402   :  { %1503 = vmatpush3.msra.mxu1 %v1100_v22  ;;  %1640 = vmatpush3.msra.mxu0 %v1211_v43 }
 0x403   :  { %1504 = vmatprep.subr.mxu1 %v1115_v25  ;;  %1641 = vmatprep.subr.mxu0 %v1997_v0 }
 0x404   :  { %1505 = vmatpush3.msra.mxu1 %v1099_v27  ;;  %1642 = vmatpush3.msra.mxu0 %v1210_v57 }
 0x405   :  { %1506 = vmatprep.subr.mxu1 %v1114_v28  ;;  %1643 = vmatprep.subr.mxu0 %v1997_v0  ;;  %v1444_v28 = vld [vmem:[%s2283_s17] ss:$0 sm:$0xff]  ;;  %s1999_s17 = smov [#allocation20]  }
 0x406   :  { %1507 = vmatpush3.msra.mxu1 %v1098_v29  ;;  %1644 = vmatpush3.msra.mxu0 %v1209_v24  ;;  %s1426_s3 = sshll.u32 %s1999_s17, 4  ;;  %s1427_s3 = int_to_ptr.vmem [resolvable:$true] %s1426_s3 }
 0x407   :  { %1508 = vmatprep.subr.mxu1 %v1113_v30  ;;  %1645 = vmatprep.subr.mxu0 %v1997_v0  ;;  %s1946_s10 = scalar_lea.vmem %s1427_s3, 128  ;;  %p1951_p0 = scmp.lt.s32.totalorder %s1427_s3, %s1427_s3 }
 0x408   :  { %1509 = vmatpush3.msra.mxu1 %v1097_v31  ;;  %1646 = vmatpush3.msra.mxu0 %v1208_v26  ;;  %p1947_p13 = scmp.ne.s32.totalorder %s1427_s3, %s1946_s10  ;;  %p1952_p1 = scmp.lt.s32.totalorder %s1946_s10, %s1946_s10 }
 0x409   :  { %1510 = vmatprep.subr.mxu1 %v1112_v32  ;;  %1647 = vmatprep.subr.mxu0 %v1997_v0 }
 0x40a   :  { %1511 = vmatpush3.msra.mxu1 %v1096_v6  ;;  %1648 = vmatpush3.msra.mxu0 %v1207_v58  ;;  %v1725_v6 = vld [vmem:[#allocation2] sm:$0xff]  ;;  %p1953_p2 = por %p1952_p1, %p1951_p0 }
 0x40b   :  { %1654 = vmatprep.subr.mxu1 %v1997_v0  ;;  %1649 = vmatprep.subr.mxu0 %v1997_v0 }
 0x40c   :  { %1650 = vmatpush3.msra.mxu0 %v1206_v23  ;;  %p1954_p3 = pnand %p1953_p2, %p1947_p13 }
 0x4ab   :  { %v1018_v47 = vpop.f32.mrf.mxu1 }
 0x4ac   :  { %v1019_v48 = vadd.f32 %v1018_v47, %v945_v45  ;;  %v1089_v49 = vpop.f32.mrf.mxu0 }
 0x4ad   :  { %v1020_v50 = vpop.f32.mrf.mxu1 }
 0x4ae   :  { %v1021_v51 = vadd.f32 %v1020_v50, %v949_v46  ;;  %v1090_v52 = vadd.f32 %v1089_v49, %v1019_v48  ;;  %v1091_v53 = vpop.f32.mrf.mxu0 }
 0x4b0   :  { %v1092_v54 = vadd.f32 %v1091_v53, %v1021_v51  ;;  %v1094_v56 = vmax.f32 %v1090_v52, 0.0 }
 0x4b2   :  { %v1095_v55 = vmax.f32 %v1092_v54, 0.0 }
 0x4b4   :  { %1199 = vmatprep.mubr.f32.mxu1 %v1095_v55 }
 0x4b5   :  { %1200 = vmatmul.mubr.f32.vlgmr.msra.gmra.mxu1 %v1094_v56 }
 0x4b6   :  { %1686 = vmatprep.mubr.msk.f32.mxu1 %vm1998_vm0, %v1997_v0  ;;  %1655 = vmatpush3.msra.mxu1 %v1315_v59 }
 0x4b7   :  { %1656 = vmatprep.subr.mxu1 %v1997_v0 }
 0x4b8   :  { %1657 = vmatpush3.msra.mxu1 %v1314_v60 }
 0x4b9   :  { %1658 = vmatprep.subr.mxu1 %v1997_v0 }
 0x4ba   :  { %1659 = vmatpush3.msra.mxu1 %v1313_v61 }
 0x4bb   :  { %1660 = vmatprep.subr.mxu1 %v1997_v0 }
 0x4bc   :  { %1661 = vmatpush3.msra.mxu1 %v1312_v62 }
 0x4bd   :  { %1662 = vmatprep.subr.mxu1 %v1997_v0 }
 0x4be   :  { %1663 = vmatpush3.msra.mxu1 %v1311_v63 }
 0x4bf   :  { %1664 = vmatprep.subr.mxu1 %v1997_v0 }
 0x4c0   :  { %1665 = vmatpush3.msra.mxu1 %v1310_v1 }
 0x4c1   :  { %1666 = vmatprep.subr.mxu1 %v1997_v0 }
 0x4c2   :  { %1667 = vmatpush3.msra.mxu1 %v1309_v2 }
 0x4c3   :  { %1668 = vmatprep.subr.mxu1 %v1997_v0 }
 0x4c4   :  { %1669 = vmatpush3.msra.mxu1 %v1308_v11 }
 0x4c5   :  { %1670 = vmatprep.subr.mxu1 %v1997_v0 }
 0x4c6   :  { %1671 = vmatpush3.msra.mxu1 %v1307_v12 }
 0x4c7   :  { %1672 = vmatprep.subr.mxu1 %v1997_v0 }
 0x4c8   :  { %1673 = vmatpush3.msra.mxu1 %v1306_v13 }
 0x4c9   :  { %1674 = vmatprep.subr.mxu1 %v1997_v0 }
 0x4ca   :  { %1675 = vmatpush3.msra.mxu1 %v1305_v14 }
 0x4cb   :  { %1676 = vmatprep.subr.mxu1 %v1997_v0 }
 0x4cc   :  { %1677 = vmatpush3.msra.mxu1 %v1304_v15 }
 0x4cd   :  { %1678 = vmatprep.subr.mxu1 %v1997_v0 }
 0x4ce   :  { %1679 = vmatpush3.msra.mxu1 %v1303_v16 }
 0x4cf   :  { %1680 = vmatprep.subr.mxu1 %v1997_v0 }
 0x4d0   :  { %1681 = vmatpush3.msra.mxu1 %v1302_v17 }
 0x4d1   :  { %1682 = vmatprep.subr.mxu1 %v1997_v0 }
 0x4d2   :  { %1683 = vmatpush3.msra.mxu1 %v1301_v18 }
 0x4d3   :  { %1684 = vmatprep.subr.mxu1 %v1997_v0 }
 0x4d4   :  { %1685 = vmatpush3.msra.mxu1 %v1300_v19 }
 0x575   :  { %v1512_v3 = vpop.f32.mrf.mxu1 }
 0x577   :  { %v1513_v5 = vpop.f32.mrf.mxu1 }
 0x578   :  { %v1514_v8 = vadd.f32 %v1513_v5, %v1512_v3 }
 0x57a   :  { %v1202_v9 = vadd.f32 %v1514_v8, %v1442_v4 }
 0x57c   :  { %v1205_v10 = vmax.f32 %v1202_v9, 0.0 }
 0x57e   :  { %1652 = vmatmul.mubr.f32.vlgmr.msra.gmra.mxu0 %v1205_v10 }
 0x63e   :  { %v1295_v21 = vpop.f32.mrf.mxu0 }
 0x63f   :  { %v1296_v22 = vadd.f32 %v1443_v20, %v1295_v21 }
 0x640   :  { %v1653_v25 = vpop.f32.mrf.mxu0 }
 0x641   :  { %1721 = vtanh.f32 %v1296_v22 }
 0x64e   :  { %v1722_v27 = vpop.eup %1721 }
 0x64f   :  { %1687 = vmatmul.mubr.f32.vlgmr.msra.gmra.mxu1 %v1722_v27 }
 0x70f   :  { %v1389_v29 = vpop.f32.mrf.mxu1 }
 0x710   :  { %v1390_v30 = vadd.f32 %v1444_v28, %v1389_v29 }
 0x711   :  { %v1688_v31 = vpop.f32.mrf.mxu1 }
 0x712   :  { %1723 = vtanh.f32 %v1390_v30 }
 0x71f   :  { %v1724_v0 = vpop.eup %1723 }
 0x720   :  { %v1397_v32 = vsel %vm1395_vm4, %v1724_v0, %v1390_v30 }
 0x721   :  { %v1402_v33 = vsub.f32 %v1725_v6, %v1397_v32  ;;  %v1399_v37 = vsel %vm1398_vm5, %v1397_v32, 0.0 }
 0x723   :  { %v1403_v35 = vmul.f32 %v1402_v33, %v1402_v33 }
 0x725   :  { %v1411_v36 = vmul.f32 %v1445_v34, %v1403_v35 }
 0x727   :  { %1412 = vadd.xlane.f32.xlu0 %v1411_v36 }
 0x72b   :  { %1400 = vadd.xlane.f32.xlu0 %v1399_v37 }
 0x7b0   :  { %v1413_v38 = vpop.xlane.xlu0 %1412 }
 0x7b1   :  { %v1414_v39 = vmul.f32 -0.5, %v1413_v38 }
 0x7b4   :  { %v1401_v40 = vpop.xlane.xlu0 %1400 }
 0x7b5   :  { %v1417_v41 = vsel %vm1416_vm6, %v1401_v40, 0.0 }
 0x7b6   :  { %v1418_v42 = vsel %vm1415_vm7, %v1414_v39, %v1417_v41 }
 0x7b7   :  { %1419 = vst [vmem:[#allocation20] sm:$0xff] %v1418_v42 }
 0x7b8   :  { %1957 = shalt.err (!%p1954_p3)
}
 0x7b9   :  { %1429 = dma.vmem_to_hbm [thread:$0]  %s1427_s3, 128, %s2284_s18, [#allocation4]  }
 0x7ba   :  { %1978 = dma.done.wait [#allocation4], 128  }
 0x7bb   :  { %1979 = vsyncadd [#allocation4], 4294967168 }
 0x7bc   :  { %1433 = vsyncpa [#allocation3], 1 }
 0x7bd   :  { %1434 = vsyncpa [#allocation6], 1 }
 0x7be   :  { %1435 = vsyncpa [#allocation9], 1 }
 0x7bf   :  { %1436 = vsyncpa [#allocation12], 1 }
 0x7c0   :  { %1437 = vsyncpa [#allocation15], 1 }
 0x7c1   :  { %1438 = vsyncpa [#allocation18], 1 }
 0x7c2   :  { %1439 = vsyncpa [#allocation4], 1 }

</bundles_post_ra>
